<compile_context>
chip_gen: v7x
topology: tpu7x:2x2x1
jax: 0.10.0
libtpu: 0.0.40
codegen_flags: <defaults>
</compile_context>

<pallas_src>
import numpy as np
import jax
import jax.numpy as jnp
from jax import lax
from jax.experimental import pallas as pl
from jax.experimental.pallas import tpu as pltpu

_EPS = 1e-12                 # torch.nn.functional.normalize default eps
_EPS_SQ = _EPS * _EPS        # clamp inside rsqrt: x*rsqrt(max(ss,eps^2)) == x/max(||x||,eps)


def _make_kernel(n_rels, n_feat, n_heads, n_tails, tb, has_alpha):
    R, F, M, N = n_rels, n_feat, n_heads, n_tails

    def kernel(*refs):
        if has_alpha:
            hT_ref, t_ref, a_ref, oh_ref, rel_ref, out_ref = refs
        else:
            hT_ref, t_ref, oh_ref, rel_ref, out_ref = refs

        hT = hT_ref[...]          # [TB, F, M]  heads, feature-major (transposed in wrapper)
        t = t_ref[...]            # [TB, N, F]
        oh = oh_ref[...]          # [TB, 1, R]  one-hot relation selector
        rt = rel_ref[...]         # [R, F, F]   full relation table (VMEM-resident)

        # ---- F.normalize(dim=-1) via rsqrt (EUP) --------------------------------
        # heads: per (b, m) row over F; F is the sublane axis of hT.
        h_ss = jnp.sum(hT * hT, axis=1, keepdims=True)                    # [TB, 1, M]
        h_n = hT * lax.rsqrt(jnp.maximum(h_ss, _EPS_SQ))                  # [TB, F, M]
        # tails: per (b, n) row over F (lane axis).
        t_ss = jnp.sum(t * t, axis=-1, keepdims=True)                     # [TB, N, 1]
        t_n = t * lax.rsqrt(jnp.maximum(t_ss, _EPS_SQ))                   # [TB, N, F]
        # relations: over the flat F*F vector == over both minor dims.
        r_ss = jnp.sum(jnp.sum(rt * rt, axis=-1, keepdims=True),
                       axis=-2, keepdims=True)                            # [R, 1, 1]
        r_n = rt * lax.rsqrt(jnp.maximum(r_ss, _EPS_SQ))                  # [R, F, F]

        # ---- per-element relation matrix: R_sel[b] = sum_r onehot[b,r] * R_n[r] --
        r_sel = jnp.zeros((tb, F, F), jnp.float32)
        for r in range(R):        # static unroll (n_rels small)
            r_sel = r_sel + oh[:, :, r:r + 1] * r_n[r:r + 1]              # [TB,1,1]*[1,F,F]

        # ---- C[b] = H_n[b]^T @ (alpha[b] @ T_n[b])  (VPU outer products) --------
        if has_alpha:
            a = a_ref[...]                                                # [TB, M, N]
            at = jnp.zeros((tb, M, F), jnp.float32)
            for n in range(N):    # static unroll
                at = at + a[:, :, n:n + 1] * t_n[:, n:n + 1, :]           # [TB,M,1]*[TB,1,F]
            c = jnp.zeros((tb, F, F), jnp.float32)
            for m in range(M):    # static unroll
                c = c + h_n[:, :, m:m + 1] * at[:, m:m + 1, :]            # [TB,F,1]*[TB,1,F]
        else:
            # alpha is None:  C[b] = (sum_m h_n[b,m])^T (sum_n t_n[b,n])
            h_sum = jnp.sum(h_n, axis=-1, keepdims=True)                  # [TB, F, 1]
            t_sum = jnp.sum(t_n, axis=1, keepdims=True)                   # [TB, 1, F]
            c = h_sum * t_sum                                             # [TB, F, F]

        # ---- score[b] = sum_{f,g} C[b,f,g] * R_sel[b,f,g]  -> lane-dense (1,TB) --
        prod = c * r_sel                                                  # [TB, F, F]
        s1 = jnp.sum(prod, axis=-1)                                       # [TB, F]
        out_ref[...] = jnp.sum(s1.T, axis=0, keepdims=True)               # [1, TB]

    return kernel


def rescal_forward(heads, tails, rels, alpha_scores, rel_emb_weight):
    """heads: [B, M, F]; tails: [B, N, F]; rels: [B] int ids;
    alpha_scores: [B, M, N] or None; rel_emb_weight: [n_rels, F*F]. Returns [B]."""
    B, M, Fdim = heads.shape
    N = tails.shape[1]
    R = rel_emb_weight.shape[0]
    assert rel_emb_weight.shape[1] == Fdim * Fdim
    has_alpha = alpha_scores is not None
    f32 = jnp.float32

    heads_t = jnp.swapaxes(heads.astype(f32), 1, 2)                 # [B, F, M] feature-major
    tails_f = tails.astype(f32)                                     # [B, N, F]
    rel_table = rel_emb_weight.astype(f32).reshape(R, Fdim, Fdim)   # [R, F, F]
    onehot = jax.nn.one_hot(rels.astype(jnp.int32), R, dtype=f32).reshape(B, 1, R)
    alpha_f = alpha_scores.astype(f32) if has_alpha else None

    # Batch tile: as large as practical for lane-dense output; TB==B for small B,
    # 128 otherwise (keeps >=2 "parallel" grid steps on v7x once B > 128).
    TB = B if B <= 128 else 128
    Bp = ((B + TB - 1) // TB) * TB
    if Bp != B:
        pad = ((0, Bp - B), (0, 0), (0, 0))
        heads_t = jnp.pad(heads_t, pad)
        tails_f = jnp.pad(tails_f, pad)
        onehot = jnp.pad(onehot, pad)
        if has_alpha:
            alpha_f = jnp.pad(alpha_f, pad)
    n_steps = Bp // TB

    kernel = _make_kernel(R, Fdim, M, N, TB, has_alpha)

    in_specs = [
        pl.BlockSpec((TB, Fdim, M), lambda i: (i, 0, 0)),           # heads (feature-major)
        pl.BlockSpec((TB, N, Fdim), lambda i: (i, 0, 0)),           # tails
    ]
    inputs = [heads_t, tails_f]
    if has_alpha:
        in_specs.append(pl.BlockSpec((TB, M, N), lambda i: (i, 0, 0)))
        inputs.append(alpha_f)
    in_specs.append(pl.BlockSpec((TB, 1, R), lambda i: (i, 0, 0)))  # one-hot selector
    inputs.append(onehot)
    in_specs.append(pl.BlockSpec((R, Fdim, Fdim), lambda i: (0, 0, 0)))  # resident table
    inputs.append(rel_table)

    out_spec = pl.BlockSpec((1, TB), lambda i: (0, i))              # lane-dense scores

    # Honest VMEM budget: double-buffered input blocks + resident table +
    # ~4 [TB, F, F] f32 intermediates, with headroom (floor 16 MiB, cap 48 MiB
    # to stay inside v7x's 64 MiB physical VMEM).
    block_bytes = 4 * (TB * Fdim * M + TB * N * Fdim
                       + (TB * M * N if has_alpha else 0) + TB * R)
    est = 2 * (2 * block_bytes + 2 * 4 * R * Fdim * Fdim) + 4 * 4 * TB * Fdim * Fdim
    vmem_bytes = int(min(max(2 * est, 16 * 2**20), 48 * 2**20))

    out = pl.pallas_call(
        kernel,
        out_shape=jax.ShapeDtypeStruct((1, Bp), f32),
        grid=(n_steps,),
        in_specs=in_specs,
        out_specs=out_spec,
        compiler_params=pltpu.CompilerParams(
            dimension_semantics=("parallel",),
            vmem_limit_bytes=vmem_bytes,
        ),
    )(*inputs)
    return out[0, :B]


# ----------------------------- pure-JAX reference -----------------------------
def reference_forward(heads, tails, rels, alpha_scores, rel_emb_weight, n_features):
    r = rel_emb_weight[rels]                                                   # [B, F*F]
    r = r / jnp.maximum(jnp.linalg.norm(r, axis=-1, keepdims=True), _EPS)
    h = heads / jnp.maximum(jnp.linalg.norm(heads, axis=-1, keepdims=True), _EPS)
    t = tails / jnp.maximum(jnp.linalg.norm(tails, axis=-1, keepdims=True), _EPS)
    r = r.reshape(-1, n_features, n_features)
    hr = jnp.einsum("bmf,bfg->bmg", h, r, precision=jax.lax.Precision.HIGHEST)
    s = jnp.einsum("bmg,bng->bmn", hr, t, precision=jax.lax.Precision.HIGHEST)
    if alpha_scores is not None:
        s = alpha_scores * s
    return s.sum(axis=(-2, -1))


if __name__ == "__main__":
    # module config: RESCAL(n_rels=8, n_features=32); heads/tails = [B, 4, 32]
    n_rels, n_features = 8, 32
    B, M, N = 4, 4, 4

    key = jax.random.PRNGKey(0)
    k1, k2, k3, k4, k5 = jax.random.split(key, 5)

    # xavier_uniform-style init for the relation embedding table [n_rels, F*F]
    limit = float(np.sqrt(6.0 / (n_rels + n_features * n_features)))
    rel_emb_weight = jax.random.uniform(
        k1, (n_rels, n_features * n_features), jnp.float32, -limit, limit)

    heads = jax.random.normal(k2, (B, M, n_features), jnp.float32)
    tails = jax.random.normal(k3, (B, N, n_features), jnp.float32)
    alpha_scores = jax.random.normal(k4, (B, M, N), jnp.float32)
    rels = jax.random.randint(k5, (B,), 0, n_rels, dtype=jnp.int32)

    # with alpha
    scores = rescal_forward(heads, tails, rels, alpha_scores, rel_emb_weight)
    jax.block_until_ready(scores)
    ref = reference_forward(heads, tails, rels, alpha_scores, rel_emb_weight, n_features)
    np.testing.assert_allclose(np.asarray(scores), np.asarray(ref), rtol=1e-5, atol=1e-5)

    # alpha = None (specialized path, no ones [B,M,N] materialized)
    scores_na = rescal_forward(heads, tails, rels, None, rel_emb_weight)
    jax.block_until_ready(scores_na)
    ref_na = reference_forward(heads, tails, rels, None, rel_emb_weight, n_features)
    np.testing.assert_allclose(np.asarray(scores_na), np.asarray(ref_na), rtol=1e-5, atol=1e-5)

    print("KERNEL_OK")
</pallas_src>

<mosaic_0001>
module attributes {stable_mosaic.version = 11 : i64} {
  func.func @kernel(%arg0: i32, %arg1: memref<4x32x4xf32, #tpu.memory_space<vmem>>, %arg2: memref<4x4x32xf32, #tpu.memory_space<vmem>>, %arg3: memref<4x4x4xf32, #tpu.memory_space<vmem>>, %arg4: memref<4x1x8xf32, #tpu.memory_space<vmem>>, %arg5: memref<8x32x32xf32, #tpu.memory_space<vmem>>, %arg6: memref<1x4xf32, #tpu.memory_space<vmem>>) attributes {dimension_semantics = [#tpu.dimension_semantics<parallel>], iteration_bounds = array<i64: 1>, scalar_prefetch = 0 : i64, scratch_operands = 0 : i64, tpu.core_type = #tpu.core_type<tc>, window_params = [{transform_indices = @transform_0, window_bounds = array<i64: 4, 32, 4>}, {transform_indices = @transform_1, window_bounds = array<i64: 4, 4, 32>}, {transform_indices = @transform_2, window_bounds = array<i64: 4, 4, 4>}, {transform_indices = @transform_3, window_bounds = array<i64: 4, 1, 8>}, {pipeline_mode = #tpu.pipeline_mode<synchronous>, transform_indices = @transform_4, window_bounds = array<i64: 8, 32, 32>}, {transform_indices = @transform_5, window_bounds = array<i64: 1, 4>}]} {
    %c0 = arith.constant 0 : index
    %c0_0 = arith.constant 0 : index
    %c0_1 = arith.constant 0 : index
    %0 = vector.load %arg1[%c0, %c0_0, %c0_1] : memref<4x32x4xf32, #tpu.memory_space<vmem>>, vector<4x32x4xf32>
    %c0_2 = arith.constant 0 : index
    %c0_3 = arith.constant 0 : index
    %c0_4 = arith.constant 0 : index
    %1 = vector.load %arg2[%c0_2, %c0_3, %c0_4] : memref<4x4x32xf32, #tpu.memory_space<vmem>>, vector<4x4x32xf32>
    %c0_5 = arith.constant 0 : index
    %c0_6 = arith.constant 0 : index
    %c0_7 = arith.constant 0 : index
    %2 = vector.load %arg4[%c0_5, %c0_6, %c0_7] : memref<4x1x8xf32, #tpu.memory_space<vmem>>, vector<4x1x8xf32>
    %c0_8 = arith.constant 0 : index
    %c0_9 = arith.constant 0 : index
    %c0_10 = arith.constant 0 : index
    %3 = vector.load %arg5[%c0_8, %c0_9, %c0_10] : memref<8x32x32xf32, #tpu.memory_space<vmem>>, vector<8x32x32xf32>
    %4 = arith.mulf %0, %0 : vector<4x32x4xf32>
    %cst = arith.constant dense<0.000000e+00> : vector<4x4xf32>
    %5 = vector.multi_reduction <add>, %4, %cst [1] : vector<4x32x4xf32> to vector<4x4xf32>
    %6 = vector.shape_cast %5 : vector<4x4xf32> to vector<4x1x4xf32>
    %cst_11 = arith.constant 1.000000e-24 : f32
    %7 = vector.broadcast %cst_11 : f32 to vector<4x1x4xf32>
    %8 = arith.maximumf %6, %7 : vector<4x1x4xf32>
    %9 = math.rsqrt %8 : vector<4x1x4xf32>
    %10 = vector.broadcast %9 : vector<4x1x4xf32> to vector<4x32x4xf32>
    %11 = arith.mulf %0, %10 : vector<4x32x4xf32>
    %12 = arith.mulf %1, %1 : vector<4x4x32xf32>
    %cst_12 = arith.constant dense<0.000000e+00> : vector<4x4xf32>
    %13 = vector.multi_reduction <add>, %12, %cst_12 [2] : vector<4x4x32xf32> to vector<4x4xf32>
    %14 = vector.shape_cast %13 : vector<4x4xf32> to vector<4x4x1xf32>
    %cst_13 = arith.constant 1.000000e-24 : f32
    %15 = vector.broadcast %cst_13 : f32 to vector<4x4x1xf32>
    %16 = arith.maximumf %14, %15 : vector<4x4x1xf32>
    %17 = math.rsqrt %16 : vector<4x4x1xf32>
    %18 = vector.broadcast %17 : vector<4x4x1xf32> to vector<4x4x32xf32>
    %19 = arith.mulf %1, %18 : vector<4x4x32xf32>
    %20 = arith.mulf %3, %3 : vector<8x32x32xf32>
    %cst_14 = arith.constant dense<0.000000e+00> : vector<8x32xf32>
    %21 = vector.multi_reduction <add>, %20, %cst_14 [2] : vector<8x32x32xf32> to vector<8x32xf32>
    %22 = vector.shape_cast %21 : vector<8x32xf32> to vector<8x32x1xf32>
    %cst_15 = arith.constant dense<0.000000e+00> : vector<8x1xf32>
    %23 = vector.multi_reduction <add>, %22, %cst_15 [1] : vector<8x32x1xf32> to vector<8x1xf32>
    %24 = vector.shape_cast %23 : vector<8x1xf32> to vector<8x1x1xf32>
    %cst_16 = arith.constant 1.000000e-24 : f32
    %25 = vector.broadcast %cst_16 : f32 to vector<8x1x1xf32>
    %26 = arith.maximumf %24, %25 : vector<8x1x1xf32>
    %27 = math.rsqrt %26 : vector<8x1x1xf32>
    %28 = vector.broadcast %27 : vector<8x1x1xf32> to vector<8x32x32xf32>
    %29 = arith.mulf %3, %28 : vector<8x32x32xf32>
    %cst_17 = arith.constant 0.000000e+00 : f32
    %30 = vector.broadcast %cst_17 : f32 to vector<4x32x32xf32>
    %31 = vector.extract_strided_slice %2 {offsets = [0, 0, 0], sizes = [4, 1, 1], strides = [1, 1, 1]} : vector<4x1x8xf32> to vector<4x1x1xf32>
    %32 = vector.extract_strided_slice %29 {offsets = [0, 0, 0], sizes = [1, 32, 32], strides = [1, 1, 1]} : vector<8x32x32xf32> to vector<1x32x32xf32>
    %33 = vector.broadcast %31 : vector<4x1x1xf32> to vector<4x32x32xf32>
    %34 = vector.broadcast %32 : vector<1x32x32xf32> to vector<4x32x32xf32>
    %35 = arith.mulf %33, %34 : vector<4x32x32xf32>
    %36 = arith.addf %30, %35 : vector<4x32x32xf32>
    %37 = vector.extract_strided_slice %2 {offsets = [0, 0, 1], sizes = [4, 1, 1], strides = [1, 1, 1]} : vector<4x1x8xf32> to vector<4x1x1xf32>
    %38 = vector.extract_strided_slice %29 {offsets = [1, 0, 0], sizes = [1, 32, 32], strides = [1, 1, 1]} : vector<8x32x32xf32> to vector<1x32x32xf32>
    %39 = vector.broadcast %37 : vector<4x1x1xf32> to vector<4x32x32xf32>
    %40 = vector.broadcast %38 : vector<1x32x32xf32> to vector<4x32x32xf32>
    %41 = arith.mulf %39, %40 : vector<4x32x32xf32>
    %42 = arith.addf %36, %41 : vector<4x32x32xf32>
    %43 = vector.extract_strided_slice %2 {offsets = [0, 0, 2], sizes = [4, 1, 1], strides = [1, 1, 1]} : vector<4x1x8xf32> to vector<4x1x1xf32>
    %44 = vector.extract_strided_slice %29 {offsets = [2, 0, 0], sizes = [1, 32, 32], strides = [1, 1, 1]} : vector<8x32x32xf32> to vector<1x32x32xf32>
    %45 = vector.broadcast %43 : vector<4x1x1xf32> to vector<4x32x32xf32>
    %46 = vector.broadcast %44 : vector<1x32x32xf32> to vector<4x32x32xf32>
    %47 = arith.mulf %45, %46 : vector<4x32x32xf32>
    %48 = arith.addf %42, %47 : vector<4x32x32xf32>
    %49 = vector.extract_strided_slice %2 {offsets = [0, 0, 3], sizes = [4, 1, 1], strides = [1, 1, 1]} : vector<4x1x8xf32> to vector<4x1x1xf32>
    %50 = vector.extract_strided_slice %29 {offsets = [3, 0, 0], sizes = [1, 32, 32], strides = [1, 1, 1]} : vector<8x32x32xf32> to vector<1x32x32xf32>
    %51 = vector.broadcast %49 : vector<4x1x1xf32> to vector<4x32x32xf32>
    %52 = vector.broadcast %50 : vector<1x32x32xf32> to vector<4x32x32xf32>
    %53 = arith.mulf %51, %52 : vector<4x32x32xf32>
    %54 = arith.addf %48, %53 : vector<4x32x32xf32>
    %55 = vector.extract_strided_slice %2 {offsets = [0, 0, 4], sizes = [4, 1, 1], strides = [1, 1, 1]} : vector<4x1x8xf32> to vector<4x1x1xf32>
    %56 = vector.extract_strided_slice %29 {offsets = [4, 0, 0], sizes = [1, 32, 32], strides = [1, 1, 1]} : vector<8x32x32xf32> to vector<1x32x32xf32>
    %57 = vector.broadcast %55 : vector<4x1x1xf32> to vector<4x32x32xf32>
    %58 = vector.broadcast %56 : vector<1x32x32xf32> to vector<4x32x32xf32>
    %59 = arith.mulf %57, %58 : vector<4x32x32xf32>
    %60 = arith.addf %54, %59 : vector<4x32x32xf32>
    %61 = vector.extract_strided_slice %2 {offsets = [0, 0, 5], sizes = [4, 1, 1], strides = [1, 1, 1]} : vector<4x1x8xf32> to vector<4x1x1xf32>
    %62 = vector.extract_strided_slice %29 {offsets = [5, 0, 0], sizes = [1, 32, 32], strides = [1, 1, 1]} : vector<8x32x32xf32> to vector<1x32x32xf32>
    %63 = vector.broadcast %61 : vector<4x1x1xf32> to vector<4x32x32xf32>
    %64 = vector.broadcast %62 : vector<1x32x32xf32> to vector<4x32x32xf32>
    %65 = arith.mulf %63, %64 : vector<4x32x32xf32>
    %66 = arith.addf %60, %65 : vector<4x32x32xf32>
    %67 = vector.extract_strided_slice %2 {offsets = [0, 0, 6], sizes = [4, 1, 1], strides = [1, 1, 1]} : vector<4x1x8xf32> to vector<4x1x1xf32>
    %68 = vector.extract_strided_slice %29 {offsets = [6, 0, 0], sizes = [1, 32, 32], strides = [1, 1, 1]} : vector<8x32x32xf32> to vector<1x32x32xf32>
    %69 = vector.broadcast %67 : vector<4x1x1xf32> to vector<4x32x32xf32>
    %70 = vector.broadcast %68 : vector<1x32x32xf32> to vector<4x32x32xf32>
    %71 = arith.mulf %69, %70 : vector<4x32x32xf32>
    %72 = arith.addf %66, %71 : vector<4x32x32xf32>
    %73 = vector.extract_strided_slice %2 {offsets = [0, 0, 7], sizes = [4, 1, 1], strides = [1, 1, 1]} : vector<4x1x8xf32> to vector<4x1x1xf32>
    %74 = vector.extract_strided_slice %29 {offsets = [7, 0, 0], sizes = [1, 32, 32], strides = [1, 1, 1]} : vector<8x32x32xf32> to vector<1x32x32xf32>
    %75 = vector.broadcast %73 : vector<4x1x1xf32> to vector<4x32x32xf32>
    %76 = vector.broadcast %74 : vector<1x32x32xf32> to vector<4x32x32xf32>
    %77 = arith.mulf %75, %76 : vector<4x32x32xf32>
    %78 = arith.addf %72, %77 : vector<4x32x32xf32>
    %c0_18 = arith.constant 0 : index
    %c0_19 = arith.constant 0 : index
    %c0_20 = arith.constant 0 : index
    %79 = vector.load %arg3[%c0_18, %c0_19, %c0_20] : memref<4x4x4xf32, #tpu.memory_space<vmem>>, vector<4x4x4xf32>
    %cst_21 = arith.constant 0.000000e+00 : f32
    %80 = vector.broadcast %cst_21 : f32 to vector<4x4x32xf32>
    %81 = vector.extract_strided_slice %79 {offsets = [0, 0, 0], sizes = [4, 4, 1], strides = [1, 1, 1]} : vector<4x4x4xf32> to vector<4x4x1xf32>
    %82 = vector.extract_strided_slice %19 {offsets = [0, 0, 0], sizes = [4, 1, 32], strides = [1, 1, 1]} : vector<4x4x32xf32> to vector<4x1x32xf32>
    %83 = vector.broadcast %81 : vector<4x4x1xf32> to vector<4x4x32xf32>
    %84 = vector.broadcast %82 : vector<4x1x32xf32> to vector<4x4x32xf32>
    %85 = arith.mulf %83, %84 : vector<4x4x32xf32>
    %86 = arith.addf %80, %85 : vector<4x4x32xf32>
    %87 = vector.extract_strided_slice %79 {offsets = [0, 0, 1], sizes = [4, 4, 1], strides = [1, 1, 1]} : vector<4x4x4xf32> to vector<4x4x1xf32>
    %88 = vector.extract_strided_slice %19 {offsets = [0, 1, 0], sizes = [4, 1, 32], strides = [1, 1, 1]} : vector<4x4x32xf32> to vector<4x1x32xf32>
    %89 = vector.broadcast %87 : vector<4x4x1xf32> to vector<4x4x32xf32>
    %90 = vector.broadcast %88 : vector<4x1x32xf32> to vector<4x4x32xf32>
    %91 = arith.mulf %89, %90 : vector<4x4x32xf32>
    %92 = arith.addf %86, %91 : vector<4x4x32xf32>
    %93 = vector.extract_strided_slice %79 {offsets = [0, 0, 2], sizes = [4, 4, 1], strides = [1, 1, 1]} : vector<4x4x4xf32> to vector<4x4x1xf32>
    %94 = vector.extract_strided_slice %19 {offsets = [0, 2, 0], sizes = [4, 1, 32], strides = [1, 1, 1]} : vector<4x4x32xf32> to vector<4x1x32xf32>
    %95 = vector.broadcast %93 : vector<4x4x1xf32> to vector<4x4x32xf32>
    %96 = vector.broadcast %94 : vector<4x1x32xf32> to vector<4x4x32xf32>
    %97 = arith.mulf %95, %96 : vector<4x4x32xf32>
    %98 = arith.addf %92, %97 : vector<4x4x32xf32>
    %99 = vector.extract_strided_slice %79 {offsets = [0, 0, 3], sizes = [4, 4, 1], strides = [1, 1, 1]} : vector<4x4x4xf32> to vector<4x4x1xf32>
    %100 = vector.extract_strided_slice %19 {offsets = [0, 3, 0], sizes = [4, 1, 32], strides = [1, 1, 1]} : vector<4x4x32xf32> to vector<4x1x32xf32>
    %101 = vector.broadcast %99 : vector<4x4x1xf32> to vector<4x4x32xf32>
    %102 = vector.broadcast %100 : vector<4x1x32xf32> to vector<4x4x32xf32>
    %103 = arith.mulf %101, %102 : vector<4x4x32xf32>
    %104 = arith.addf %98, %103 : vector<4x4x32xf32>
    %cst_22 = arith.constant 0.000000e+00 : f32
    %105 = vector.broadcast %cst_22 : f32 to vector<4x32x32xf32>
    %106 = vector.extract_strided_slice %11 {offsets = [0, 0, 0], sizes = [4, 32, 1], strides = [1, 1, 1]} : vector<4x32x4xf32> to vector<4x32x1xf32>
    %107 = vector.extract_strided_slice %104 {offsets = [0, 0, 0], sizes = [4, 1, 32], strides = [1, 1, 1]} : vector<4x4x32xf32> to vector<4x1x32xf32>
    %108 = vector.broadcast %106 : vector<4x32x1xf32> to vector<4x32x32xf32>
    %109 = vector.broadcast %107 : vector<4x1x32xf32> to vector<4x32x32xf32>
    %110 = arith.mulf %108, %109 : vector<4x32x32xf32>
    %111 = arith.addf %105, %110 : vector<4x32x32xf32>
    %112 = vector.extract_strided_slice %11 {offsets = [0, 0, 1], sizes = [4, 32, 1], strides = [1, 1, 1]} : vector<4x32x4xf32> to vector<4x32x1xf32>
    %113 = vector.extract_strided_slice %104 {offsets = [0, 1, 0], sizes = [4, 1, 32], strides = [1, 1, 1]} : vector<4x4x32xf32> to vector<4x1x32xf32>
    %114 = vector.broadcast %112 : vector<4x32x1xf32> to vector<4x32x32xf32>
    %115 = vector.broadcast %113 : vector<4x1x32xf32> to vector<4x32x32xf32>
    %116 = arith.mulf %114, %115 : vector<4x32x32xf32>
    %117 = arith.addf %111, %116 : vector<4x32x32xf32>
    %118 = vector.extract_strided_slice %11 {offsets = [0, 0, 2], sizes = [4, 32, 1], strides = [1, 1, 1]} : vector<4x32x4xf32> to vector<4x32x1xf32>
    %119 = vector.extract_strided_slice %104 {offsets = [0, 2, 0], sizes = [4, 1, 32], strides = [1, 1, 1]} : vector<4x4x32xf32> to vector<4x1x32xf32>
    %120 = vector.broadcast %118 : vector<4x32x1xf32> to vector<4x32x32xf32>
    %121 = vector.broadcast %119 : vector<4x1x32xf32> to vector<4x32x32xf32>
    %122 = arith.mulf %120, %121 : vector<4x32x32xf32>
    %123 = arith.addf %117, %122 : vector<4x32x32xf32>
    %124 = vector.extract_strided_slice %11 {offsets = [0, 0, 3], sizes = [4, 32, 1], strides = [1, 1, 1]} : vector<4x32x4xf32> to vector<4x32x1xf32>
    %125 = vector.extract_strided_slice %104 {offsets = [0, 3, 0], sizes = [4, 1, 32], strides = [1, 1, 1]} : vector<4x4x32xf32> to vector<4x1x32xf32>
    %126 = vector.broadcast %124 : vector<4x32x1xf32> to vector<4x32x32xf32>
    %127 = vector.broadcast %125 : vector<4x1x32xf32> to vector<4x32x32xf32>
    %128 = arith.mulf %126, %127 : vector<4x32x32xf32>
    %129 = arith.addf %123, %128 : vector<4x32x32xf32>
    %130 = arith.mulf %129, %78 : vector<4x32x32xf32>
    %cst_23 = arith.constant dense<0.000000e+00> : vector<4x32xf32>
    %131 = vector.multi_reduction <add>, %130, %cst_23 [2] : vector<4x32x32xf32> to vector<4x32xf32>
    %132 = tpu.transpose %131, [1, 0] : vector<4x32xf32> -> vector<32x4xf32>
    %cst_24 = arith.constant dense<0.000000e+00> : vector<4xf32>
    %133 = vector.multi_reduction <add>, %132, %cst_24 [0] : vector<32x4xf32> to vector<4xf32>
    %134 = vector.shape_cast %133 : vector<4xf32> to vector<1x4xf32>
    %c0_25 = arith.constant 0 : index
    %c0_26 = arith.constant 0 : index
    %135 = vector.load %arg6[%c0_25, %c0_26] : memref<1x4xf32, #tpu.memory_space<vmem>>, vector<1x4xf32>
    tpu.vector_store %arg6[%c0_25, %c0_26], %134 {strides = array<i32>} : memref<1x4xf32, #tpu.memory_space<vmem>>, vector<1x4xf32>,
    return
  }
  func.func @transform_0(%arg0: i32) -> (i32, i32, i32) {
    %c0_i32 = arith.constant 0 : i32
    %c0_i32_0 = arith.constant 0 : i32
    %c0_i32_1 = arith.constant 0 : i32
    return %arg0, %c0_i32, %c0_i32_0 : i32, i32, i32
  }
  func.func @transform_1(%arg0: i32) -> (i32, i32, i32) {
    %c0_i32 = arith.constant 0 : i32
    %c0_i32_0 = arith.constant 0 : i32
    %c0_i32_1 = arith.constant 0 : i32
    return %arg0, %c0_i32, %c0_i32_0 : i32, i32, i32
  }
  func.func @transform_2(%arg0: i32) -> (i32, i32, i32) {
    %c0_i32 = arith.constant 0 : i32
    %c0_i32_0 = arith.constant 0 : i32
    %c0_i32_1 = arith.constant 0 : i32
    return %arg0, %c0_i32, %c0_i32_0 : i32, i32, i32
  }
  func.func @transform_3(%arg0: i32) -> (i32, i32, i32) {
    %c0_i32 = arith.constant 0 : i32
    %c0_i32_0 = arith.constant 0 : i32
    %c0_i32_1 = arith.constant 0 : i32
    return %arg0, %c0_i32, %c0_i32_0 : i32, i32, i32
  }
  func.func @transform_4(%arg0: i32) -> (i32, i32, i32) {
    %c0_i32 = arith.constant 0 : i32
    %c0_i32_0 = arith.constant 0 : i32
    %c0_i32_1 = arith.constant 0 : i32
    %c0_i32_2 = arith.constant 0 : i32
    return %c0_i32, %c0_i32_0, %c0_i32_1 : i32, i32, i32
  }
  func.func @transform_5(%arg0: i32) -> (i32, i32) {
    %c0_i32 = arith.constant 0 : i32
    %c0_i32_0 = arith.constant 0 : i32
    return %c0_i32, %arg0 : i32, i32
  }
}

</mosaic_0001>

<bundles_post_ra>
// kernel: tpu_custom_call.1
= control target key start
LH: loop header
LB: loop body
LE: loop exit
PB: predicated region body
PF: predicated region fallthrough
CT: control target
= control target key end

     0   :  { %10 = vsyncpa [#allocation3], 0  ;;  %s3314_s0 = inlined_call_operand.vmem [shape: f32[4,32,4], index: 0, kind: input, shape index: {}]   ;;  %s3315_s1 = inlined_call_operand.vmem [shape: f32[4,4,32], index: 1, kind: input, shape index: {}]   ;;  %s3316_s2 = inlined_call_operand.vmem [shape: f32[4,4,4], index: 2, kind: input, shape index: {}]   ;;  %s3317_s3 = inlined_call_operand.vmem [shape: f32[4,1,8], index: 3, kind: input, shape index: {}]   ;;  %s3318_s4 = inlined_call_operand.hbm [shape: f32[8,32,32], index: 4, kind: input, shape index: {}]   ;;  %s3319_s5 = inlined_call_operand.hbm [shape: f32[1,4], index: 5, kind: output, shape index: {}]  }
   0x1   :  { %11 = vsyncpa [#allocation4], 0  ;;  %s1873_s18 = smov [#allocation2]   ;;  %s1825_s22 = scalar_lea.hbm %s3318_s4, 4096 }
   0x2   :  { %s25_s19 = sshll.u32 %s1873_s18, 4  ;;  %p1826_p0 = scmp.ne.s32.totalorder %s3318_s4, %s1825_s22  ;;  %s26_s19 = int_to_ptr.vmem [resolvable:$true] %s25_s19 }
   0x3   :  { %p1829_p1 = scmp.lt.u32.totalorder %s1825_s22, %s3318_s4 }
   0x5   :  { %p1831_p2 = pnand %p1829_p1, %p1826_p0 }
   0x7   :  { %1834 = shalt.err (!%p1831_p2)
}
   0x8   :  { %s1835_s27 = scalar_lea.vmem %s26_s19, 4096  ;;  %p1840_p4 = scmp.lt.s32.totalorder %s26_s19, %s26_s19 }
   0x9   :  { %p1836_p3 = scmp.ne.s32.totalorder %s26_s19, %s1835_s27  ;;  %p1841_p5 = scmp.lt.s32.totalorder %s1835_s27, %s1835_s27 }
   0xb   :  { %p1842_p6 = por %p1841_p5, %p1840_p4 }
   0xd   :  { %p1843_p7 = pnand %p1842_p6, %p1836_p3 }
   0xf   :  { %1846 = shalt.err (!%p1843_p7)
}
  0x10   :  { %s1874_s28 = smov 128   ;;  %s1875_s29 = smov 8  }
  0x11   :  { %31 = dma.hbm_to_vmem [thread:$0]  %s3318_s4, 4096, %s26_s19, [#allocation3], %s1874_s28, %s1874_s28, %s1875_s29  }
  0x12   :  { %1869 = dma.done.wait [#allocation3], 4096  }
  0x13   :  { %1870 = vsyncadd [#allocation3], 4294963200  ;;  %v3326_v0 = vmov 0   ;;  %v1877_v1 = vmov 4   ;;  %vm188_vm0 = vcmask 257024   ;;  %v1941_v10 = vld [vmem:[#allocation2 + $0x8] sm:$0xff] }
  0x14   :  { %1748 = vset.pattern.permute.xlu1 %v3326_v0  ;;  %1753 = vset.pattern.permute.xlu0 %v1877_v1  ;;  %v53_v2 = vld [vmem:[%s3315_s1 + $0x8] sm:$0xf]  ;;  %v51_v3 = vld [vmem:[%s3315_s1] sm:$0xf]  ;;  %v54_v4 = vld [vmem:[%s3315_s1 + $0xc] sm:$0xf]  ;;  %v214_v16 = vmul.f32 %v1941_v10, %v1941_v10 }
  0x15   :  { %v186_v5 = vmul.f32 %v53_v2, %v53_v2  ;;  %v184_v6 = vmul.f32 %v51_v3, %v51_v3  ;;  %v187_v7 = vmul.f32 %v54_v4, %v54_v4  ;;  %v52_v8 = vld [vmem:[%s3315_s1 + $0x4] sm:$0xf]  ;;  %vm245_vm1 = vcmask 261120   ;;  %v1953_v18 = vld [vmem:[#allocation2 + $0x18] sm:$0xff]  ;;  %v1955_v19 = vld [vmem:[#allocation2 + $0x10] sm:$0xff] }
  0x16   :  { %v185_v9 = vmul.f32 %v52_v8, %v52_v8  ;;  %v1943_v11 = vld [vmem:[#allocation2] sm:$0xff]  ;;  %v249_v20 = vsel %vm245_vm1, %v214_v16, 0.0  ;;  %v216_v22 = vmul.f32 %v1953_v18, %v1953_v18  ;;  %v215_v23 = vmul.f32 %v1955_v19, %v1955_v19  ;;  %v1963_v24 = vld [vmem:[#allocation2 + $0x28] sm:$0xff]  ;;  %v1973_v30 = vld [vmem:[#allocation2 + $0x38] sm:$0xff] }
  0x17   :  { %v195_v12 = vsel %vm188_vm0, %v186_v5, 0.0  ;;  %v189_v13 = vsel %vm188_vm0, %v184_v6, 0.0  ;;  %v198_v14 = vsel %vm188_vm0, %v187_v7, 0.0  ;;  %v213_v17 = vmul.f32 %v1943_v11, %v1943_v11  ;;  %v1965_v25 = vld [vmem:[#allocation2 + $0x20] sm:$0xff]  ;;  %v1975_v31 = vld [vmem:[#allocation2 + $0x30] sm:$0xff]  ;;  %v68_v36 = vld [vmem:[#allocation2 + $0x48] sm:$0xff] }
  0x18   :  { %196 = vadd.xlane.f32.xlu1 %v195_v12  ;;  %190 = vadd.xlane.f32.xlu0 %v189_v13  ;;  %v192_v15 = vsel %vm188_vm0, %v185_v9, 0.0  ;;  %v255_v26 = vsel %vm245_vm1, %v216_v22, 0.0  ;;  %v252_v27 = vsel %vm245_vm1, %v215_v23, 0.0  ;;  %v218_v28 = vmul.f32 %v1963_v24, %v1963_v24  ;;  %v67_v37 = vld [vmem:[#allocation2 + $0x40] sm:$0xff]  ;;  %v70_v42 = vld [vmem:[#allocation2 + $0x58] sm:$0xff]  ;;  %v69_v43 = vld [vmem:[#allocation2 + $0x50] sm:$0xff] }
  0x19   :  { %v246_v21 = vsel %vm245_vm1, %v213_v17, 0.0  ;;  %v217_v29 = vmul.f32 %v1965_v25, %v1965_v25  ;;  %v220_v34 = vmul.f32 %v1973_v30, %v1973_v30  ;;  %v219_v35 = vmul.f32 %v1975_v31, %v1975_v31  ;;  %v72_v48 = vld [vmem:[#allocation2 + $0x68] sm:$0xff]  ;;  %v71_v49 = vld [vmem:[#allocation2 + $0x60] sm:$0xff]  ;;  %v74_v54 = vld [vmem:[#allocation2 + $0x78] sm:$0xff] }
  0x1a   :  { %v261_v32 = vsel %vm245_vm1, %v218_v28, 0.0  ;;  %v222_v40 = vmul.f32 %v68_v36, %v68_v36  ;;  %v221_v41 = vmul.f32 %v67_v37, %v67_v37  ;;  %v224_v46 = vmul.f32 %v70_v42, %v70_v42  ;;  %v73_v55 = vld [vmem:[#allocation2 + $0x70] sm:$0xff]  ;;  %v76_v60 = vld [vmem:[#allocation2 + $0x88] sm:$0xff]  ;;  %v75_v61 = vld [vmem:[#allocation2 + $0x80] sm:$0xff] }
  0x1b   :  { %v258_v33 = vsel %vm245_vm1, %v217_v29, 0.0  ;;  %v267_v38 = vsel %vm245_vm1, %v220_v34, 0.0  ;;  %v264_v39 = vsel %vm245_vm1, %v219_v35, 0.0  ;;  %v223_v47 = vmul.f32 %v69_v43, %v69_v43  ;;  %v78_v4 = vld [vmem:[#allocation2 + $0x98] sm:$0xff]  ;;  %v77_v5 = vld [vmem:[#allocation2 + $0x90] sm:$0xff]  ;;  %v1995_v12 = vld [vmem:[#allocation2 + $0xa8] sm:$0xff] }
  0x1c   :  { %199 = vadd.xlane.f32.xlu1 %v198_v14  ;;  %193 = vadd.xlane.f32.xlu0 %v192_v15  ;;  %v273_v44 = vsel %vm245_vm1, %v222_v40, 0.0  ;;  %v270_v45 = vsel %vm245_vm1, %v221_v41, 0.0  ;;  %v279_v50 = vsel %vm245_vm1, %v224_v46, 0.0  ;;  %v226_v52 = vmul.f32 %v72_v48, %v72_v48  ;;  %v1997_v13 = vld [vmem:[#allocation2 + $0xa0] sm:$0xff]  ;;  %v2015_v28 = vld [vmem:[#allocation2 + $0xc8] sm:$0xff]  ;;  %v2025_v36 = vld [vmem:[#allocation2 + $0xd8] sm:$0xff] }
  0x1d   :  { %v276_v51 = vsel %vm245_vm1, %v223_v47, 0.0  ;;  %v225_v53 = vmul.f32 %v71_v49, %v71_v49  ;;  %v228_v58 = vmul.f32 %v74_v54, %v74_v54  ;;  %v227_v59 = vmul.f32 %v73_v55, %v73_v55  ;;  %v2017_v29 = vld [vmem:[#allocation2 + $0xc0] sm:$0xff]  ;;  %v2027_v37 = vld [vmem:[#allocation2 + $0xd0] sm:$0xff]  ;;  %v88_v42 = vld [vmem:[#allocation2 + $0xe8] sm:$0xff] }
  0x1e   :  { %v285_v56 = vsel %vm245_vm1, %v226_v52, 0.0  ;;  %v230_v2 = vmul.f32 %v76_v60, %v76_v60  ;;  %v229_v3 = vmul.f32 %v75_v61, %v75_v61  ;;  %v232_v8 = vmul.f32 %v78_v4, %v78_v4  ;;  %v2035_v43 = vld [vmem:[#allocation2 + $0xe0] sm:$0xff]  ;;  %v2041_v48 = vld [vmem:[#allocation2 + $0xf8] sm:$0xff]  ;;  %v2043_v49 = vld [vmem:[#allocation2 + $0xf0] sm:$0xff] }
  0x1f   :  { %v282_v57 = vsel %vm245_vm1, %v225_v53, 0.0  ;;  %v291_v62 = vsel %vm245_vm1, %v228_v58, 0.0  ;;  %v288_v63 = vsel %vm245_vm1, %v227_v59, 0.0  ;;  %v231_v9 = vmul.f32 %v77_v5, %v77_v5  ;;  %3399 = vst [vmem:[#allocation8_spill] sm:$0xff] %v2035_v43  ;;  %3400 = vst [vmem:[#allocation9_spill] sm:$0xff] %v2041_v48  ;;  %v2073_v59 = vld [vmem:[%s3314_s0 + $0x20] sm:$0xff] }
  0x20   :  { %250 = vadd.xlane.f32.xlu1 %v249_v20  ;;  %247 = vadd.xlane.f32.xlu0 %v246_v21  ;;  %v297_v6 = vsel %vm245_vm1, %v230_v2, 0.0  ;;  %v294_v7 = vsel %vm245_vm1, %v229_v3, 0.0  ;;  %v303_v14 = vsel %vm245_vm1, %v232_v8, 0.0  ;;  %v234_v16 = vmul.f32 %v1995_v12, %v1995_v12  ;;  %v2005_v20 = vld [vmem:[#allocation2 + $0xb8] sm:$0xff]  ;;  %v2007_v21 = vld [vmem:[#allocation2 + $0xb0] sm:$0xff]  ;;  %3401 = vst [vmem:[#allocation10_spill] sm:$0xff] %v2043_v49 }
  0x21   :  { %v300_v15 = vsel %vm245_vm1, %v231_v9, 0.0  ;;  %v233_v17 = vmul.f32 %v1997_v13, %v1997_v13  ;;  %v238_v34 = vmul.f32 %v2015_v28, %v2015_v28  ;;  %v237_v35 = vmul.f32 %v2017_v29, %v2017_v29  ;;  %v2078_v60 = vld [vmem:[%s3314_s0 + $0x28] sm:$0xff]  ;;  %v2087_v2 = vld [vmem:[%s3314_s0 + $0x18] sm:$0xff] }
  0x22   :  { %v309_v22 = vsel %vm245_vm1, %v234_v16, 0.0  ;;  %v240_v40 = vmul.f32 %v2025_v36, %v2025_v36  ;;  %v239_v41 = vmul.f32 %v2027_v37, %v2027_v37  ;;  %v242_v46 = vmul.f32 %v88_v42, %v88_v42 }
  0x23   :  { %v306_v23 = vsel %vm245_vm1, %v233_v17, 0.0  ;;  %v241_v47 = vmul.f32 %v2035_v43, %v2035_v43  ;;  %v244_v54 = vmul.f32 %v2041_v48, %v2041_v48  ;;  %v243_v55 = vmul.f32 %v2043_v49, %v2043_v49 }
  0x24   :  { %256 = vadd.xlane.f32.xlu1 %v255_v26  ;;  %253 = vadd.xlane.f32.xlu0 %v252_v27  ;;  %v236_v26 = vmul.f32 %v2005_v20, %v2005_v20  ;;  %v235_v27 = vmul.f32 %v2007_v21, %v2007_v21  ;;  %v333_v52 = vsel %vm245_vm1, %v242_v46, 0.0  ;;  %vm107_vm2 = vcmask 31744  }
  0x25   :  { %v330_v53 = vsel %vm245_vm1, %v241_v47, 0.0  ;;  %v339_v61 = vsel %vm245_vm1, %v244_v54, 0.0  ;;  %v95_v5 = vmul.f32 %v2073_v59, %v2073_v59  ;;  %v94_v8 = vmul.f32 %v2087_v2, %v2087_v2  ;;  %v2153_v54 = vld [vmem:[%s3314_s0 + $0x68] sm:$0xff] }
  0x26   :  { %vm1589_vm3 = vcmask 130112   ;;  %vm1596_vm4 = vcmask 195712   ;;  %vm1603_vm5 = vcmask 261312   ;;  %vm1662_vm6 = vcmask 1041409  }
  0x27   :  { %v121_v16 = vsel %vm107_vm2, %v95_v5, 0.0  ;;  %v2170_v5 = vld [vmem:[%s3314_s0 + $0x70] sm:$0xff]  ;;  %vm1664_vm7 = vcmask 1042434   ;;  %vm1666_vm8 = vcmask 1043459   ;;  %vm1714_vm9 = vcmask 24576  }
  0x28   :  { %262 = vadd.xlane.f32.xlu1 %v261_v32  ;;  %259 = vadd.xlane.f32.xlu0 %v258_v33  ;;  %v315_v32 = vsel %vm245_vm1, %v236_v26, 0.0  ;;  %v312_v33 = vsel %vm245_vm1, %v235_v27, 0.0  ;;  %v2120_v26 = vld [vmem:[%s3314_s0 + $0x48] sm:$0xff] }
  0x2c   :  { %268 = vadd.xlane.f32.xlu1 %v267_v38  ;;  %265 = vadd.xlane.f32.xlu0 %v264_v39  ;;  %v321_v38 = vsel %vm245_vm1, %v238_v34, 0.0  ;;  %v318_v39 = vsel %vm245_vm1, %v237_v35, 0.0 }
  0x30   :  { %274 = vadd.xlane.f32.xlu1 %v273_v44  ;;  %271 = vadd.xlane.f32.xlu0 %v270_v45  ;;  %v327_v44 = vsel %vm245_vm1, %v240_v40, 0.0  ;;  %v324_v45 = vsel %vm245_vm1, %v239_v41, 0.0  ;;  %v2133_v40 = vld [vmem:[%s3314_s0 + $0x50] sm:$0xff] }
  0x34   :  { %280 = vadd.xlane.f32.xlu1 %v279_v50  ;;  %277 = vadd.xlane.f32.xlu0 %v276_v51  ;;  %v2048_v50 = vld [vmem:[%s3314_s0] sm:$0xff]  ;;  %v2053_v51 = vld [vmem:[%s3314_s0 + $0x8] sm:$0xff] }
  0x35   :  { %v92_v58 = vmul.f32 %v2053_v51, %v2053_v51 }
  0x37   :  { %v109_v4 = vsel %vm107_vm2, %v92_v58, 0.0 }
  0x38   :  { %286 = vadd.xlane.f32.xlu1 %v285_v56  ;;  %283 = vadd.xlane.f32.xlu0 %v282_v57  ;;  %v2064_v56 = vld [vmem:[%s3314_s0 + $0x10] sm:$0xff]  ;;  %v91_v57 = vmul.f32 %v2048_v50, %v2048_v50 }
  0x3a   :  { %v108_v3 = vsel %vm107_vm2, %v91_v57, 0.0 }
  0x3b   :  { %v110_v9 = vadd.f32 %v109_v4, %v108_v3  ;;  %v104_v4 = vmul.f32 %v2153_v54, %v2153_v54 }
  0x3c   :  { %292 = vadd.xlane.f32.xlu1 %v291_v62  ;;  %289 = vadd.xlane.f32.xlu0 %v288_v63  ;;  %v336_v62 = vsel %vm245_vm1, %v243_v55, 0.0  ;;  %v93_v63 = vmul.f32 %v2064_v56, %v2064_v56 }
  0x40   :  { %298 = vadd.xlane.f32.xlu1 %v297_v6  ;;  %295 = vadd.xlane.f32.xlu0 %v294_v7  ;;  %v96_v6 = vmul.f32 %v2078_v60, %v2078_v60  ;;  %v2098_v7 = vld [vmem:[%s3314_s0 + $0x30] sm:$0xff] }
  0x42   :  { %v122_v17 = vsel %vm107_vm2, %v96_v6, 0.0 }
  0x44   :  { %304 = vadd.xlane.f32.xlu1 %v303_v14  ;;  %301 = vadd.xlane.f32.xlu0 %v300_v15  ;;  %v111_v14 = vsel %vm107_vm2, %v93_v63, 0.0  ;;  %v97_v15 = vmul.f32 %v2098_v7, %v2098_v7 }
  0x45   :  { %v112_v27 = vadd.f32 %v111_v14, %v110_v9  ;;  %v2176_v14 = vld [vmem:[%s3317_s3 + $0x2] ss:$0 sm:$0xff] }
  0x46   :  { %v124_v35 = vsel %vm107_vm2, %v97_v15, 0.0 }
  0x48   :  { %310 = vadd.xlane.f32.xlu1 %v309_v22  ;;  %307 = vadd.xlane.f32.xlu0 %v306_v23  ;;  %v2110_v22 = vld [vmem:[%s3314_s0 + $0x38] sm:$0xff]  ;;  %v2115_v23 = vld [vmem:[%s3314_s0 + $0x40] sm:$0xff] }
  0x49   :  { %v98_v34 = vmul.f32 %v2110_v22, %v2110_v22 }
  0x4c   :  { %316 = vadd.xlane.f32.xlu1 %v315_v32  ;;  %313 = vadd.xlane.f32.xlu0 %v312_v33  ;;  %v113_v32 = vsel %vm107_vm2, %v94_v8, 0.0  ;;  %v123_v33 = vadd.f32 %v122_v17, %v121_v16  ;;  %v105_v16 = vmul.f32 %v2170_v5, %v2170_v5 }
  0x4d   :  { %v114_v41 = vadd.f32 %v113_v32, %v112_v27  ;;  %v148_v27 = vsel %vm107_vm2, %v104_v4, 0.0  ;;  %v2186_v32 = vld [vmem:[%s3314_s0 + $0x78] sm:$0xff] }
  0x4e   :  { %v125_v42 = vadd.f32 %v124_v35, %v123_v33 }
  0x4f   :  { %v115_v55 = vrot.slane %v114_v41, 4 }
  0x50   :  { %322 = vadd.xlane.f32.xlu1 %v321_v38  ;;  %319 = vadd.xlane.f32.xlu0 %v318_v39  ;;  %v99_v38 = vmul.f32 %v2115_v23, %v2115_v23  ;;  %v100_v39 = vmul.f32 %v2120_v26, %v2120_v26 }
  0x51   :  { %v116_v6 = vadd.f32 %v115_v55, %v114_v41  ;;  %v106_v41 = vmul.f32 %v2186_v32, %v2186_v32 }
  0x52   :  { %v134_v46 = vsel %vm107_vm2, %v99_v38, 0.0  ;;  %v135_v47 = vsel %vm107_vm2, %v100_v39, 0.0  ;;  %v2193_v39 = vld [vmem:[%s3317_s3 + $0x3] ss:$0 sm:$0xff] }
  0x53   :  { %v136_v58 = vadd.f32 %v135_v47, %v134_v46  ;;  %v117_v33 = vrot.slane %v116_v6, 2  ;;  %3402 = vst [vmem:[#allocation11_spill] sm:$0xff] %v2193_v39 }
  0x54   :  { %328 = vadd.xlane.f32.xlu1 %v327_v44  ;;  %325 = vadd.xlane.f32.xlu0 %v324_v45  ;;  %v126_v44 = vsel %vm107_vm2, %v98_v34, 0.0  ;;  %v101_v45 = vmul.f32 %v2133_v40, %v2133_v40 }
  0x55   :  { %v127_v57 = vadd.f32 %v126_v44, %v125_v42  ;;  %v150_v42 = vsel %vm107_vm2, %v105_v16, 0.0  ;;  %v2201_v44 = vld [vmem:[%s3317_s3] ss:$0 sm:$0xff] }
  0x56   :  { %v137_v63 = vsel %vm107_vm2, %v101_v45, 0.0  ;;  %3403 = vst [vmem:[#allocation12_spill] sm:$0xff] %v2201_v44  ;;  %v118_v45 = vadd.f32 %v117_v33, %v116_v6 }
  0x57   :  { %v128_v8 = vrot.slane %v127_v57, 4  ;;  %v138_v9 = vadd.f32 %v137_v63, %v136_v58  ;;  %v152_v58 = vsel %vm107_vm2, %v106_v41, 0.0 }
  0x58   :  { %334 = vadd.xlane.f32.xlu1 %v333_v52  ;;  %331 = vadd.xlane.f32.xlu0 %v330_v53  ;;  %v2143_v52 = vld [vmem:[%s3314_s0 + $0x58] sm:$0xff]  ;;  %v2148_v53 = vld [vmem:[%s3314_s0 + $0x60] sm:$0xff]  ;;  %v119_v63 = vrot.slane %v118_v45, 1 }
  0x59   :  { %v103_v3 = vmul.f32 %v2148_v53, %v2148_v53  ;;  %v129_v34 = vadd.f32 %v128_v8, %v127_v57  ;;  %v1878_v57 = vmov 5  }
  0x5a   :  { %v120_v6 = vadd.f32 %v119_v63, %v118_v45 }
  0x5b   :  { %v147_v17 = vsel %vm107_vm2, %v103_v3, 0.0  ;;  %v130_v46 = vrot.slane %v129_v34, 2 }
  0x5c   :  { %340 = vadd.xlane.f32.xlu1 %v339_v61  ;;  %337 = vadd.xlane.f32.xlu0 %v336_v62  ;;  %v2158_v61 = vld [vmem:[%s3317_s3 + $0x1] ss:$0 sm:$0xff]  ;;  %v102_v62 = vmul.f32 %v2143_v52, %v2143_v52  ;;  %v149_v38 = vadd.f32 %v148_v27, %v147_v17  ;;  %v1880_v17 = vmov 6   ;;  %v160_v27 = vmax.f32 %v120_v6, 1e-24 }
  0x5d   :  { %v131_v3 = vadd.f32 %v130_v46, %v129_v34 }
  0x5e   :  { %v139_v15 = vsel %vm107_vm2, %v102_v62, 0.0  ;;  %v151_v55 = vadd.f32 %v150_v42, %v149_v38  ;;  %v3324_v62 = vmov 1   ;;  %v3328_v38 = vmov 7  }
  0x5f   :  { %v140_v35 = vadd.f32 %v139_v15, %v138_v9  ;;  %v132_v9 = vrot.slane %v131_v3, 1  ;;  %1776 = vrsqrt.f32 %v160_v27  ;;  %v3320_v27 = vmov 3  }
  0x60   :  { %v153_v8 = vadd.f32 %v152_v58, %v151_v55  ;;  %v3322_v55 = vmov 2  }
  0x61   :  { %v141_v47 = vrot.slane %v140_v35, 4  ;;  %v133_v33 = vadd.f32 %v132_v9, %v131_v3 }
  0x62   :  { %v154_v16 = vrot.slane %v153_v8, 4 }
  0x63   :  { %v142_v4 = vadd.f32 %v141_v47, %v140_v35  ;;  %v161_v41 = vmax.f32 %v133_v33, 1e-24 }
  0x64   :  { %v155_v35 = vadd.f32 %v154_v16, %v153_v8 }
  0x65   :  { %v143_v15 = vrot.slane %v142_v4, 2  ;;  %1778 = vrsqrt.f32 %v161_v41 }
  0x66   :  { %v156_v45 = vrot.slane %v155_v35, 2 }
  0x67   :  { %v144_v34 = vadd.f32 %v143_v15, %v142_v4  ;;  %v2228_v4 = vld [vmem:[%s3316_s2 + $0x4] sm:$0xf] }
  0x68   :  { %v157_v47 = vadd.f32 %v156_v45, %v155_v35 }
  0x69   :  { %v145_v42 = vrot.slane %v144_v34, 1  ;;  %v2222_v3 = vpop.eup %1776 }
  0x6a   :  { %v158_v63 = vrot.slane %v157_v47, 1  ;;  %v2233_v6 = vmul.f32 %v2222_v3, %v2053_v51 }
  0x6b   :  { %v146_v46 = vadd.f32 %v145_v42, %v144_v34 }
  0x6c   :  { %v159_v8 = vadd.f32 %v158_v63, %v157_v47 }
  0x6d   :  { %487 = vperm.xlu1 %1748, %v2158_v61   ;;  %v162_v58 = vmax.f32 %v146_v46, 1e-24 }
  0x6e   :  { %v163_v15 = vmax.f32 %v159_v8, 1e-24  ;;  %v2308_v8 = vmul.f32 %v2222_v3, %v2048_v50 }
  0x6f   :  { %1780 = vrsqrt.f32 %v162_v58  ;;  %v2235_v9 = vpop.eup %1778 }
  0x70   :  { %v2241_v16 = vmul.f32 %v2235_v9, %v2073_v59  ;;  %1782 = vrsqrt.f32 %v163_v15  ;;  %v2248_v51 = vmul.f32 %v2235_v9, %v2098_v7  ;;  %v2320_v50 = vmul.f32 %v2235_v9, %v2078_v60 }
  0x71   :  { %491 = vperm.xlu1 %1748, %v2176_v14  }
  0x72   :  { %679 = vperm.xlu0 %1753, %v2158_v61   ;;  %3404 = vst [vmem:[#allocation13_spill] sm:$0xff] %v2241_v16  ;;  %3405 = vst [vmem:[#allocation14_spill] sm:$0xff] %v2248_v51 }
  0x73   :  { %3413 = vst [vmem:[#allocation22_spill] sm:$0xff] %v2320_v50 }
  0x75   :  { %495 = vperm.xlu1 %1748, %v2193_v39  }
  0x76   :  { %1754 = vset.pattern.permute.xlu0 %v1878_v57 }
  0x77   :  { %723 = vperm.xlu0 %1754, %v2201_v44  }
  0x79   :  { %1749 = vset.pattern.permute.xlu1 %v3324_v62  ;;  %v2250_v33 = vpop.eup %1780 }
  0x7a   :  { %531 = vperm.xlu1 %1749, %v2201_v44   ;;  %v2256_v59 = vmul.f32 %v2250_v33, %v2115_v23  ;;  %v2263_v7 = vmul.f32 %v2250_v33, %v2133_v40  ;;  %v2265_v34 = vpop.eup %1782  ;;  %v2332_v60 = vmul.f32 %v2250_v33, %v2120_v26 }
  0x7b   :  { %735 = vperm.xlu0 %1754, %v2193_v39   ;;  %v2285_v42 = vmul.f32 %v2265_v34, %v2170_v5  ;;  %v2301_v5 = vld [vmem:[%s3316_s2 + $0xc] sm:$0xf] }
  0x7c   :  { %3416 = vst [vmem:[#allocation24_spill] sm:$0xff] %v2332_v60 }
  0x7d   :  { %3411 = vst [vmem:[#allocation20_spill] sm:$0xff] %v2285_v42 }
  0x7e   :  { %535 = vperm.xlu1 %1749, %v2158_v61  }
  0x7f   :  { %1757 = vset.pattern.permute.xlu0 %v1880_v17 }
  0x80   :  { %775 = vperm.xlu0 %1757, %v2158_v61  }
  0x82   :  { %539 = vperm.xlu1 %1749, %v2176_v14  }
  0x84   :  { %1758 = vset.pattern.permute.xlu0 %v3328_v38 }
  0x85   :  { %819 = vperm.xlu0 %1758, %v2201_v44  }
  0x86   :  { %543 = vperm.xlu1 %1749, %v2193_v39  }
  0x89   :  { %831 = vperm.xlu0 %1758, %v2193_v39  }
  0x8a   :  { %1750 = vset.pattern.permute.xlu1 %v3322_v55  ;;  %v2314_v55 = vmul.f32 %v2222_v3, %v2087_v2  ;;  %v2326_v2 = vmul.f32 %v2235_v9, %v2110_v22  ;;  %v2338_v9 = vmul.f32 %v2250_v33, %v2143_v52  ;;  %v2354_v52 = vmul.f32 %v2265_v34, %v2153_v54 }
  0x8b   :  { %579 = vperm.xlu1 %1750, %v2201_v44  }
  0x8c   :  { %3412 = vst [vmem:[#allocation21_spill] sm:$0xff] %v2314_v55  ;;  %3415 = vst [vmem:[#allocation23_spill] sm:$0xff] %v2326_v2 }
  0x8d   :  { %1760 = vset.pattern.permute.xlu0 %v3326_v0  ;;  %3418 = vst [vmem:[#allocation25_spill] sm:$0xff] %v2354_v52 }
  0x8e   :  { %483 = vperm.xlu0 %1760, %v2201_v44  }
  0x8f   :  { %587 = vperm.xlu1 %1750, %v2176_v14  }
  0x92   :  { %877 = vperm.xlu0 %1760, %v2228_v4  }
  0x93   :  { %591 = vperm.xlu1 %1750, %v2193_v39  }
  0x96   :  { %1041 = vperm.xlu0 %1760, %v2233_v6  }
  0x97   :  { %1751 = vset.pattern.permute.xlu1 %v3320_v27 }
  0x98   :  { %631 = vperm.xlu1 %1751, %v2158_v61  }
  0x9a   :  { %1056 = vperm.xlu0 %1760, %v2241_v16  }
  0x9c   :  { %635 = vperm.xlu1 %1751, %v2176_v14  }
  0x9e   :  { %1066 = vperm.xlu0 %1760, %v2248_v51  }
  0xa0   :  { %1752 = vset.pattern.permute.xlu1 %v1877_v1  ;;  %v2275_v1 = vmul.f32 %v2265_v34, %v2148_v53  ;;  %v2293_v53 = vld [vmem:[%s3316_s2] sm:$0xf] }
  0xa1   :  { %675 = vperm.xlu1 %1752, %v2201_v44  }
  0xa2   :  { %1076 = vperm.xlu0 %1760, %v2256_v59   ;;  %3408 = vst [vmem:[#allocation17_spill] sm:$0xff] %v2275_v1 }
  0xa5   :  { %683 = vperm.xlu1 %1752, %v2176_v14   ;;  %v2268_v35 = vpop.xlane.xlu1 %196  ;;  %v2270_v41 = vpop.xlane.xlu0 %190 }
  0xa6   :  { %3406 = vst [vmem:[#allocation15_spill] sm:$0xff] %v2268_v35  ;;  %3407 = vst [vmem:[#allocation16_spill] sm:$0xff] %v2270_v41  ;;  %1086 = vperm.xlu0 %1760, %v2263_v7   ;;  %v3414_v35 = vmov 7  }
  0xa9   :  { %687 = vperm.xlu1 %1752, %v2193_v39   ;;  %v2278_v23 = vpop.xlane.xlu1 %199  ;;  %v2280_v40 = vpop.xlane.xlu0 %193 }
  0xaa   :  { %3409 = vst [vmem:[#allocation18_spill] sm:$0xff] %v2278_v23  ;;  %3410 = vst [vmem:[#allocation19_spill] sm:$0xff] %v2280_v40  ;;  %1096 = vperm.xlu0 %1760, %v2275_v1  }
  0xad   :  { %1755 = vset.pattern.permute.xlu1 %v1878_v57  ;;  %v251_v45 = vpop.xlane.xlu1 %250  ;;  %v248_v46 = vpop.xlane.xlu0 %247 }
  0xae   :  { %727 = vperm.xlu1 %1755, %v2158_v61   ;;  %1106 = vperm.xlu0 %1760, %v2285_v42   ;;  %v342_v41 = vadd.f32 %v251_v45, %v248_v46 }
  0xb1   :  { %v257_v47 = vpop.xlane.xlu1 %256  ;;  %v254_v58 = vpop.xlane.xlu0 %253 }
  0xb2   :  { %731 = vperm.xlu1 %1755, %v2176_v14   ;;  %1766 = vset.pattern.permute.xlu0 %v3324_v62  ;;  %v343_v40 = vadd.f32 %v342_v41, %v254_v58  ;;  %v3417_v41 = vmov 0  }
  0xb3   :  { %915 = vperm.xlu0 %1766, %v2293_v53  }
  0xb5   :  { %v263_v57 = vpop.xlane.xlu1 %262  ;;  %v260_v63 = vpop.xlane.xlu0 %259 }
  0xb6   :  { %1756 = vset.pattern.permute.xlu1 %v1880_v17  ;;  %v351_v23 = vadd.f32 %v263_v57, %v260_v63 }
  0xb7   :  { %771 = vperm.xlu1 %1756, %v2201_v44   ;;  %927 = vperm.xlu0 %1766, %v2301_v5  }
  0xb9   :  { %v269_v15 = vpop.xlane.xlu1 %268  ;;  %v266_v27 = vpop.xlane.xlu0 %265 }
  0xba   :  { %v352_v51 = vadd.f32 %v351_v23, %v266_v27 }
  0xbb   :  { %779 = vperm.xlu1 %1756, %v2176_v14   ;;  %1163 = vperm.xlu0 %1766, %v2308_v8  }
  0xbc   :  { %v353_v22 = vadd.f32 %v352_v51, %v269_v15  ;;  %v2349_v51 = vld [vmem:[%s3316_s2 + $0x8] sm:$0xf] }
  0xbd   :  { %v275_v62 = vpop.xlane.xlu1 %274  ;;  %v272_v17 = vpop.xlane.xlu0 %271 }
  0xbf   :  { %783 = vperm.xlu1 %1756, %v2193_v39   ;;  %1175 = vperm.xlu0 %1766, %v2314_v55  }
  0xc1   :  { %v281_v0 = vpop.xlane.xlu1 %280  ;;  %v278_v38 = vpop.xlane.xlu0 %277 }
  0xc3   :  { %1759 = vset.pattern.permute.xlu1 %v3414_v35  ;;  %1183 = vperm.xlu0 %1766, %v2320_v50   ;;  %v344_v35 = vadd.f32 %v343_v40, %v257_v47  ;;  %v360_v40 = vadd.f32 %v275_v62, %v272_v17 }
  0xc4   :  { %823 = vperm.xlu1 %1759, %v2158_v61  }
  0xc5   :  { %v287_v1 = vpop.xlane.xlu1 %286  ;;  %v284_v16 = vpop.xlane.xlu0 %283  ;;  %v345_v27 = vrot.slane %v344_v35, 4  ;;  %v361_v63 = vadd.f32 %v360_v40, %v278_v38 }
  0xc7   :  { %1191 = vperm.xlu0 %1766, %v2326_v2   ;;  %v346_v33 = vadd.f32 %v345_v27, %v344_v35  ;;  %v362_v54 = vadd.f32 %v361_v63, %v281_v0  ;;  %v3419_v35 = vmov 1  }
  0xc8   :  { %827 = vperm.xlu1 %1759, %v2176_v14   ;;  %v354_v14 = vrot.slane %v353_v22, 4 }
  0xc9   :  { %v293_v45 = vpop.xlane.xlu1 %292  ;;  %v290_v46 = vpop.xlane.xlu0 %289  ;;  %v347_v15 = vrot.slane %v346_v33, 2  ;;  %v363_v38 = vrot.slane %v362_v54, 4 }
  0xca   :  { %v355_v57 = vadd.f32 %v354_v14, %v353_v22  ;;  %v3420_v14 = vmov 2  }
  0xcb   :  { %1199 = vperm.xlu0 %1766, %v2332_v60   ;;  %v348_v17 = vadd.f32 %v347_v15, %v346_v33  ;;  %v364_v33 = vadd.f32 %v363_v38, %v362_v54 }
  0xcc   :  { %1761 = vset.pattern.permute.xlu1 %v3417_v41  ;;  %v356_v48 = vrot.slane %v355_v57, 2 }
  0xcd   :  { %872 = vperm.xlu1 %1761, %v2293_v53   ;;  %v2342_v23 = vpop.xlane.xlu1 %298  ;;  %v2344_v26 = vpop.xlane.xlu0 %295  ;;  %v349_v50 = vrot.slane %v348_v17, 1  ;;  %v365_v39 = vrot.slane %v364_v33, 2 }
  0xce   :  { %v357_v43 = vadd.f32 %v356_v48, %v355_v57 }
  0xcf   :  { %1207 = vperm.xlu0 %1766, %v2338_v9   ;;  %v350_v57 = vadd.f32 %v349_v50, %v348_v17 }
  0xd1   :  { %882 = vperm.xlu1 %1761, %v2349_v51   ;;  %v2357_v47 = vpop.xlane.xlu1 %304  ;;  %v2359_v58 = vpop.xlane.xlu0 %301 }
  0xd3   :  { %1215 = vperm.xlu0 %1766, %v2354_v52  }
  0xd5   :  { %887 = vperm.xlu1 %1761, %v2301_v5   ;;  %v311_v60 = vpop.xlane.xlu1 %310  ;;  %v308_v2 = vpop.xlane.xlu0 %307 }
  0xd6   :  { %v387_v62 = vadd.f32 %v311_v60, %v308_v2  ;;  %v369_v2 = vadd.f32 %v287_v1, %v284_v16 }
  0xd7   :  { %1219 = vperm.xlu0 %1766, %v2285_v42   ;;  %v358_v42 = vrot.slane %v357_v43, 1 }
  0xd8   :  { %v370_v15 = vadd.f32 %v369_v2, %v290_v46  ;;  %v414_v46 = vmax.f32 %v350_v57, 1e-24 }
  0xd9   :  { %1762 = vset.pattern.permute.xlu1 %v3419_v35  ;;  %v317_v27 = vpop.xlane.xlu1 %316  ;;  %v314_v49 = vpop.xlane.xlu0 %313 }
  0xda   :  { %v388_v22 = vadd.f32 %v387_v62, %v314_v49  ;;  %919 = vperm.xlu1 %1762, %v2228_v4   ;;  %v371_v16 = vadd.f32 %v370_v15, %v293_v45  ;;  %1784 = vrsqrt.f32 %v414_v46 }
  0xdb   :  { %1769 = vset.pattern.permute.xlu0 %v3420_v14 }
  0xdc   :  { %v389_v40 = vadd.f32 %v388_v22, %v317_v27  ;;  %583 = vperm.xlu0 %1769, %v2158_v61   ;;  %v359_v27 = vadd.f32 %v358_v42, %v357_v43  ;;  %v378_v43 = vadd.f32 %v2342_v23, %v2344_v26  ;;  %v372_v42 = vrot.slane %v371_v16, 4 }
  0xdd   :  { %v323_v0 = vpop.xlane.xlu1 %322  ;;  %v320_v63 = vpop.xlane.xlu0 %319 }
  0xde   :  { %v390_v60 = vrot.slane %v389_v40, 4  ;;  %923 = vperm.xlu1 %1762, %v2349_v51   ;;  %v396_v49 = vadd.f32 %v323_v0, %v320_v63  ;;  %v366_v0 = vadd.f32 %v365_v39, %v364_v33  ;;  %v379_v2 = vadd.f32 %v378_v43, %v2359_v58 }
  0xdf   :  { %v373_v23 = vadd.f32 %v372_v42, %v371_v16 }
  0xe0   :  { %v391_v48 = vadd.f32 %v390_v60, %v389_v40  ;;  %959 = vperm.xlu0 %1769, %v2228_v4   ;;  %v415_v40 = vmax.f32 %v359_v27, 1e-24  ;;  %v367_v33 = vrot.slane %v366_v0, 1 }
  0xe1   :  { %v329_v62 = vpop.xlane.xlu1 %328  ;;  %v326_v35 = vpop.xlane.xlu0 %325 }
  0xe2   :  { %v392_v22 = vrot.slane %v391_v48, 2  ;;  %v397_v61 = vadd.f32 %v396_v49, %v326_v35  ;;  %1763 = vset.pattern.permute.xlu1 %v3420_v14  ;;  %1786 = vrsqrt.f32 %v415_v40 }
  0xe3   :  { %955 = vperm.xlu1 %1763, %v2293_v53  }
  0xe4   :  { %v393_v1 = vadd.f32 %v392_v22, %v391_v48  ;;  %v398_v44 = vadd.f32 %v397_v61, %v329_v62  ;;  %1279 = vperm.xlu0 %1769, %v2233_v6   ;;  %v368_v22 = vadd.f32 %v367_v33, %v366_v0  ;;  %v3421_v61 = vmov 3  }
  0xe5   :  { %v335_v54 = vpop.xlane.xlu1 %334  ;;  %v332_v38 = vpop.xlane.xlu0 %331 }
  0xe6   :  { %v394_v50 = vrot.slane %v393_v1, 1  ;;  %v399_v17 = vrot.slane %v398_v44, 4  ;;  %v405_v45 = vadd.f32 %v335_v54, %v332_v38  ;;  %v416_v43 = vmax.f32 %v368_v22, 1e-24 }
  0xe7   :  { %963 = vperm.xlu1 %1763, %v2349_v51  }
  0xe8   :  { %v395_v35 = vadd.f32 %v394_v50, %v393_v1  ;;  %v400_v63 = vadd.f32 %v399_v17, %v398_v44  ;;  %1307 = vperm.xlu0 %1769, %v2256_v59   ;;  %v380_v44 = vadd.f32 %v379_v2, %v2357_v47  ;;  %v374_v1 = vrot.slane %v373_v23, 2  ;;  %v1785_v47 = vpop.eup %1784 }
  0xe9   :  { %v341_v60 = vpop.xlane.xlu1 %340  ;;  %v338_v15 = vpop.xlane.xlu0 %337 }
  0xea   :  { %v419_v48 = vmax.f32 %v395_v35, 1e-24  ;;  %v401_v49 = vrot.slane %v400_v63, 2  ;;  %v406_v39 = vadd.f32 %v405_v45, %v338_v15  ;;  %v381_v16 = vrot.slane %v380_v44, 4 }
  0xeb   :  { %967 = vperm.xlu1 %1763, %v2301_v5   ;;  %v2386_v35 = vadd.f32 %v374_v1, %v373_v23  ;;  %v2396_v45 = vmul.f32 %v2265_v34, %v2186_v32  ;;  %v2399_v15 = vmul.f32 %v1785_v47, %v1943_v11  ;;  %v2414_v32 = vmul.f32 %v1785_v47, %v1953_v18 }
  0xec   :  { %1788 = vrsqrt.f32 %v419_v48  ;;  %v402_v26 = vadd.f32 %v401_v49, %v400_v63  ;;  %v407_v57 = vadd.f32 %v406_v39, %v341_v60  ;;  %1287 = vperm.xlu0 %1769, %v2314_v55   ;;  %v1787_v42 = vpop.eup %1786  ;;  %v2402_v48 = vmul.f32 %v1785_v47, %v1941_v10 }
  0xed   :  { %v488_v62 = vpop.permute.xlu1 %487  ;;  %v2411_v39 = vmul.f32 %v1785_v47, %v1955_v19  ;;  %v2417_v34 = vmul.f32 %v1787_v42, %v1965_v25  ;;  %v376_v11 = vrot.slane %v2386_v35, 1 }
  0xee   :  { %v403_v27 = vrot.slane %v402_v26, 1  ;;  %v408_v58 = vrot.slane %v407_v57, 4  ;;  %3422 = vst [vmem:[#allocation26_spill] sm:$0xff] %v2402_v48  ;;  %v502_v23 = vmul.f32 %v488_v62, %v2399_v15 }
  0xef   :  { %1764 = vset.pattern.permute.xlu1 %v3421_v61 }
  0xf0   :  { %v404_v46 = vadd.f32 %v403_v27, %v402_v26  ;;  %v409_v54 = vadd.f32 %v408_v58, %v407_v57  ;;  %999 = vperm.xlu1 %1764, %v2228_v4   ;;  %1315 = vperm.xlu0 %1769, %v2263_v7   ;;  %v2390_v4 = vadd.f32 %v381_v16, %v380_v44 }
  0xf1   :  { %v492_v38 = vpop.permute.xlu1 %491  ;;  %v2384_v40 = vpop.permute.xlu0 %679  ;;  %v504_v57 = vmul.f32 %v488_v62, %v2411_v39  ;;  %v505_v27 = vmul.f32 %v488_v62, %v2414_v32 }
  0xf2   :  { %v420_v50 = vmax.f32 %v404_v46, 1e-24  ;;  %v410_v17 = vrot.slane %v409_v54, 2  ;;  %v383_v19 = vrot.slane %v2390_v4, 2  ;;  %v506_v58 = vmul.f32 %v492_v38, %v2399_v15 }
  0xf3   :  { %v507_v22 = vmul.f32 %v492_v38, %v2402_v48  ;;  %v508_v1 = vmul.f32 %v492_v38, %v2411_v39  ;;  %v509_v46 = vmul.f32 %v492_v38, %v2414_v32 }
  0xf4   :  { %1790 = vrsqrt.f32 %v420_v50  ;;  %v411_v0 = vadd.f32 %v410_v17, %v409_v54  ;;  %1003 = vperm.xlu1 %1764, %v2349_v51   ;;  %1327 = vperm.xlu0 %1769, %v2354_v52   ;;  %v2408_v51 = vmul.f32 %v2222_v3, %v2064_v56  ;;  %v2423_v56 = vmul.f32 %v1787_v42, %v1963_v24 }
  0xf5   :  { %v2392_v63 = vpop.permute.xlu1 %495  ;;  %1792 = vrsqrt.f32 %v416_v43  ;;  %v2426_v3 = vmul.f32 %v1787_v42, %v1975_v31 }
  0xf6   :  { %v1789_v2 = vpop.eup %1788  ;;  %v412_v60 = vrot.slane %v411_v0, 1  ;;  %v2404_v49 = vpop.permute.xlu0 %723  ;;  %3424 = vst [vmem:[#allocation28_spill] sm:$0xff] %v2423_v56 }
  0xf7   :  { %3423 = vst [vmem:[#allocation27_spill] sm:$0xff] %v2404_v49  ;;  %v2430_v18 = vmul.f32 %v1789_v2, %v1997_v13  ;;  %v2433_v25 = vmul.f32 %v1789_v2, %v1995_v12  ;;  %v2443_v31 = vmul.f32 %v1789_v2, %v2007_v21  ;;  %v2446_v26 = vmul.f32 %v1789_v2, %v2005_v20 }
  0xf8   :  { %v413_v10 = vadd.f32 %v412_v60, %v411_v0  ;;  %1765 = vset.pattern.permute.xlu1 %v3417_v41  ;;  %1319 = vperm.xlu0 %1769, %v2338_v9   ;;  %v2438_v41 = vmul.f32 %v1787_v42, %v1973_v30  ;;  %v503_v12 = vmul.f32 %v488_v62, %v2402_v48 }
  0xf9   :  { %v2435_v33 = vpop.permute.xlu1 %531  ;;  %1036 = vperm.xlu1 %1765, %v2308_v8  }
  0xfa   :  { %3425 = vst [vmem:[#allocation29_spill] sm:$0xff] %v2435_v33  ;;  %v421_v24 = vmax.f32 %v413_v10, 1e-24  ;;  %v736_v13 = vpop.permute.xlu0 %735 }
  0xfb   :  { %v2451_v44 = vmul.f32 %v736_v13, %v2430_v18  ;;  %v2454_v30 = vmul.f32 %v736_v13, %v2433_v25  ;;  %v2458_v21 = vmul.f32 %v736_v13, %v2443_v31  ;;  %v2461_v20 = vmul.f32 %v736_v13, %v2446_v26 }
  0xfc   :  { %1794 = vrsqrt.f32 %v421_v24  ;;  %1335 = vperm.xlu0 %1769, %v2396_v45  }
  0xfd   :  { %3426 = vst [vmem:[#allocation30_spill] sm:$0xff] %v2451_v44  ;;  %3427 = vst [vmem:[#allocation31_spill] sm:$0xff] %v2454_v30  ;;  %v536_v54 = vpop.permute.xlu1 %535  ;;  %1046 = vperm.xlu1 %1765, %v2408_v51   ;;  %v510_v30 = vmul.f32 %v2392_v63, %v2399_v15  ;;  %v511_v44 = vmul.f32 %v2392_v63, %v2402_v48 }
  0xfe   :  { %3428 = vst [vmem:[#allocation32_spill] sm:$0xff] %v2458_v21  ;;  %3429 = vst [vmem:[#allocation33_spill] sm:$0xff] %v2461_v20  ;;  %v1791_v62 = vpop.eup %1790  ;;  %v550_v16 = vmul.f32 %v536_v54, %v2417_v34  ;;  %v551_v50 = vmul.f32 %v536_v54, %v2423_v56  ;;  %v552_v17 = vmul.f32 %v536_v54, %v2426_v3 }
  0xff   :  { %v553_v47 = vmul.f32 %v536_v54, %v2438_v41  ;;  %v2474_v43 = vmul.f32 %v1791_v62, %v2017_v29  ;;  %v2477_v42 = vmul.f32 %v1791_v62, %v2015_v28  ;;  %v2480_v38 = vmul.f32 %v1791_v62, %v2027_v37  ;;  %v776_v2 = vpop.permute.xlu0 %775  ;;  %v2494_v13 = vpop.eup %1792  ;;  %v3439_v54 = vld [vmem:[#allocation12_spill] sm:$0xff] }
 0x100   :  { %v2483_v0 = vmul.f32 %v1791_v62, %v2025_v36  ;;  %1775 = vset.pattern.permute.xlu0 %v3421_v61  ;;  %v2486_v60 = vadd.f32 %v550_v16, %v502_v23  ;;  %v2488_v10 = vadd.f32 %v551_v50, %v503_v12  ;;  %v2490_v24 = vadd.f32 %v552_v17, %v504_v57 }
 0x101   :  { %3430 = vst [vmem:[#allocation34_spill] sm:$0xff] %v2474_v43  ;;  %3431 = vst [vmem:[#allocation35_spill] sm:$0xff] %v2477_v42  ;;  %v2492_v29 = vadd.f32 %v553_v47, %v505_v27  ;;  %v2497_v28 = vmul.f32 %v776_v2, %v2474_v43  ;;  %v2500_v37 = vmul.f32 %v776_v2, %v2477_v42  ;;  %v540_v12 = vpop.permute.xlu1 %539  ;;  %627 = vperm.xlu0 %1775, %v3439_v54  }
 0x102   :  { %3432 = vst [vmem:[#allocation36_spill] sm:$0xff] %v2480_v38  ;;  %3433 = vst [vmem:[#allocation37_spill] sm:$0xff] %v2483_v0  ;;  %v2503_v36 = vmul.f32 %v776_v2, %v2480_v38  ;;  %v2506_v23 = vmul.f32 %v776_v2, %v2483_v0  ;;  %v554_v57 = vmul.f32 %v540_v12, %v2417_v34  ;;  %1051 = vperm.xlu1 %1765, %v2314_v55   ;;  %v3446_v55 = vld [vmem:[#allocation9_spill] sm:$0xff] }
 0x103   :  { %3434 = vst [vmem:[#allocation38_spill] sm:$0xff] %v2492_v29  ;;  %3435 = vst [vmem:[#allocation39_spill] sm:$0xff] %v2497_v28  ;;  %v555_v27 = vmul.f32 %v540_v12, %v2423_v56  ;;  %v556_v62 = vmul.f32 %v540_v12, %v2426_v3  ;;  %v557_v16 = vmul.f32 %v540_v12, %v2438_v41 }
 0x104   :  { %3436 = vst [vmem:[#allocation40_spill] sm:$0xff] %v2500_v37  ;;  %3437 = vst [vmem:[#allocation41_spill] sm:$0xff] %v2503_v36  ;;  %v377_v50 = vadd.f32 %v376_v11, %v2386_v35  ;;  %v384_v17 = vadd.f32 %v383_v19, %v2390_v4  ;;  %v570_v47 = vadd.f32 %v554_v57, %v506_v58  ;;  %v2518_v54 = vpop.permute.xlu0 %819  ;;  %v3441_v11 = vld [vmem:[#allocation11_spill] sm:$0xff]  ;;  %v3442_v57 = vld [vmem:[#allocation22_spill] sm:$0xff] }
 0x105   :  { %3438 = vst [vmem:[#allocation42_spill] sm:$0xff] %v2506_v23  ;;  %v2516_v2 = vadd.f32 %v555_v27, %v507_v22  ;;  %v572_v21 = vadd.f32 %v556_v62, %v508_v1  ;;  %v573_v20 = vadd.f32 %v557_v16, %v509_v46  ;;  %3440 = vst [vmem:[#allocation12_spill] sm:$0xff] %v2518_v54  ;;  %v544_v4 = vpop.permute.xlu1 %543  ;;  %639 = vperm.xlu0 %1775, %v3441_v11   ;;  %v3443_v62 = vld [vmem:[#allocation8_spill] sm:$0xff] }
 0x106   :  { %v512_v12 = vmul.f32 %v2392_v63, %v2411_v39  ;;  %v513_v35 = vmul.f32 %v2392_v63, %v2414_v32  ;;  %v2529_v19 = vpop.eup %1794  ;;  %v558_v58 = vmul.f32 %v544_v4, %v2417_v34  ;;  %v559_v22 = vmul.f32 %v544_v4, %v2423_v56  ;;  %1061 = vperm.xlu1 %1765, %v3442_v57   ;;  %v3444_v63 = vld [vmem:[#allocation10_spill] sm:$0xff] }
 0x107   :  { %v560_v1 = vmul.f32 %v544_v4, %v2426_v3  ;;  %v561_v46 = vmul.f32 %v544_v4, %v2438_v41  ;;  %v417_v27 = vmax.f32 %v377_v50, 1e-24  ;;  %v2538_v16 = vmul.f32 %v2529_v19, %v3443_v62 }
 0x108   :  { %v2542_v11 = vmul.f32 %v2529_v19, %v3444_v63  ;;  %v2546_v49 = vmul.f32 %v2529_v19, %v3446_v55  ;;  %v574_v56 = vadd.f32 %v558_v58, %v510_v30  ;;  %v2548_v48 = vadd.f32 %v559_v22, %v511_v44  ;;  %v2550_v36 = vpop.permute.xlu0 %831  ;;  %v3453_v44 = vld [vmem:[#allocation23_spill] sm:$0xff]  ;;  %v1809_v58 = vld [vmem:[#allocation2 + $0x50] sm:$0xff] }
 0x109   :  { %v576_v23 = vadd.f32 %v560_v1, %v512_v12  ;;  %v577_v4 = vadd.f32 %v561_v46, %v513_v35  ;;  %3449 = vst [vmem:[#allocation10_spill] sm:$0xff] %v2550_v36  ;;  %v385_v50 = vrot.slane %v384_v17, 1  ;;  %v2554_v62 = vmul.f32 %v2518_v54, %v2538_v16  ;;  %995 = vperm.xlu0 %1775, %v2293_v53   ;;  %v1808_v12 = vld [vmem:[#allocation2 + $0x40] sm:$0xff] }
 0x10a   :  { %3445 = vst [vmem:[#allocation11_spill] sm:$0xff] %v2542_v11  ;;  %3447 = vst [vmem:[#allocation22_spill] sm:$0xff] %v2546_v49  ;;  %v2558_v63 = vmul.f32 %v2518_v54, %v2542_v11  ;;  %v2562_v55 = vmul.f32 %v2518_v54, %v2546_v49  ;;  %1071 = vperm.xlu1 %1765, %v3453_v44   ;;  %v2566_v30 = vpop.permute.xlu1 %579  ;;  %1796 = vrsqrt.f32 %v417_v27 }
 0x10b   :  { %3448 = vst [vmem:[#allocation8_spill] sm:$0xff] %v2548_v48  ;;  %3450 = vst [vmem:[#allocation9_spill] sm:$0xff] %v2554_v62  ;;  %v2569_v35 = vmul.f32 %v1808_v12, %v2494_v13  ;;  %v2572_v22 = vmul.f32 %v1809_v58, %v2494_v13  ;;  %v386_v1 = vadd.f32 %v385_v50, %v384_v17  ;;  %v3456_v50 = vld [vmem:[#allocation24_spill] sm:$0xff] }
 0x10c   :  { %3451 = vst [vmem:[#allocation43_spill] sm:$0xff] %v2558_v63  ;;  %3452 = vst [vmem:[#allocation44_spill] sm:$0xff] %v2562_v55  ;;  %v546_v46 = vmul.f32 %v2435_v33, %v2417_v34  ;;  %v548_v53 = vmul.f32 %v2435_v33, %v2426_v3  ;;  %v1810_v55 = vld [vmem:[#allocation2 + $0x58] sm:$0xff]  ;;  %v549_v12 = vmul.f32 %v2435_v33, %v2438_v41 }
 0x10d   :  { %3454 = vst [vmem:[#allocation45_spill] sm:$0xff] %v2566_v30  ;;  %v2579_v36 = vmul.f32 %v1810_v55, %v2494_v13  ;;  %v2581_v27 = vpop.permute.xlu0 %483  ;;  %1007 = vperm.xlu0 %1775, %v2301_v5   ;;  %v594_v58 = vmul.f32 %v2566_v30, %v2569_v35  ;;  %v418_v37 = vmax.f32 %v386_v1, 1e-24  ;;  %v3460_v1 = vld [vmem:[#allocation14_spill] sm:$0xff] }
 0x10e   :  { %3455 = vst [vmem:[#allocation46_spill] sm:$0xff] %v2581_v27  ;;  %v498_v17 = vmul.f32 %v2581_v27, %v2399_v15  ;;  %v500_v34 = vmul.f32 %v2581_v27, %v2411_v39  ;;  %v501_v3 = vmul.f32 %v2581_v27, %v2414_v32  ;;  %1081 = vperm.xlu1 %1765, %v3456_v50   ;;  %v588_v55 = vpop.permute.xlu1 %587 }
 0x10f   :  { %v602_v5 = vmul.f32 %v588_v55, %v2569_v35  ;;  %v604_v63 = vmul.f32 %v588_v55, %v2572_v22  ;;  %v605_v41 = vmul.f32 %v588_v55, %v2579_v36  ;;  %v596_v15 = vmul.f32 %v2566_v30, %v2572_v22 }
 0x110   :  { %v562_v62 = vadd.f32 %v546_v46, %v498_v17  ;;  %v564_v39 = vadd.f32 %v548_v53, %v500_v34  ;;  %v565_v48 = vadd.f32 %v549_v12, %v501_v3  ;;  %v597_v28 = vmul.f32 %v2566_v30, %v2579_v36 }
 0x111   :  { %v618_v54 = vadd.f32 %v602_v5, %v570_v47  ;;  %v620_v32 = vadd.f32 %v604_v63, %v572_v21  ;;  %v621_v33 = vadd.f32 %v605_v41, %v573_v20  ;;  %1391 = vperm.xlu0 %1775, %v2233_v6   ;;  %v2601_v27 = vpop.permute.xlu0 %877  ;;  %1798 = vrsqrt.f32 %v418_v37  ;;  %v1812_v5 = vld [vmem:[#allocation2 + $0x70] sm:$0xff] }
 0x112   :  { %1091 = vperm.xlu1 %1765, %v2338_v9   ;;  %v2606_v61 = vpop.permute.xlu1 %591  ;;  %v2608_v29 = vadd.f32 %v594_v58, %v562_v62  ;;  %v2610_v46 = vadd.f32 %v596_v15, %v564_v39  ;;  %v2618_v63 = vadd.f32 %v597_v28, %v565_v48  ;;  %v1811_v28 = vld [vmem:[#allocation2 + $0x60] sm:$0xff] }
 0x113   :  { %v606_v21 = vmul.f32 %v2606_v61, %v2569_v35  ;;  %v608_v20 = vmul.f32 %v2606_v61, %v2572_v22  ;;  %v609_v47 = vmul.f32 %v2606_v61, %v2579_v36 }
 0x114   :  { %3457 = vst [vmem:[#allocation47_spill] sm:$0xff] %v2608_v29  ;;  %3458 = vst [vmem:[#allocation48_spill] sm:$0xff] %v2610_v46  ;;  %v1797_v34 = vpop.eup %1796  ;;  %v3483_v29 = vld [vmem:[#allocation17_spill] sm:$0xff] }
 0x115   :  { %3459 = vst [vmem:[#allocation49_spill] sm:$0xff] %v2618_v63  ;;  %1411 = vperm.xlu0 %1775, %v3460_v1   ;;  %v2621_v53 = vpop.permute.xlu0 %1041  ;;  %v2623_v12 = vadd.f32 %v606_v21, %v574_v56  ;;  %v2625_v62 = vadd.f32 %v608_v20, %v576_v23  ;;  %v2627_v17 = vadd.f32 %v609_v47, %v577_v4  ;;  %v1813_v23 = vld [vmem:[#allocation2 + $0x78] sm:$0xff]  ;;  %v1814_v4 = vld [vmem:[#allocation2 + $0x48] sm:$0xff] }
 0x116   :  { %3461 = vst [vmem:[#allocation14_spill] sm:$0xff] %v2621_v53  ;;  %1101 = vperm.xlu1 %1765, %v2354_v52   ;;  %v2635_v58 = vmul.f32 %v1811_v28, %v1797_v34  ;;  %v2637_v56 = vmul.f32 %v1812_v5, %v1797_v34  ;;  %v2639_v41 = vmul.f32 %v1813_v23, %v1797_v34  ;;  %v1815_v47 = vld [vmem:[#allocation2 + $0x68] sm:$0xff] }
 0x117   :  { %3462 = vst [vmem:[#allocation50_spill] sm:$0xff] %v2623_v12  ;;  %3463 = vst [vmem:[#allocation51_spill] sm:$0xff] %v2625_v62  ;;  %v2630_v3 = vpop.permute.xlu1 %631  ;;  %v2643_v15 = vmul.f32 %v1814_v4, %v2494_v13  ;;  %v2648_v28 = vmul.f32 %v1815_v47, %v1797_v34  ;;  %v3470_v13 = vmov 1   ;;  %v1816_v47 = vld [vmem:[#allocation2 + $0x80] sm:$0xff] }
 0x118   :  { %3464 = vst [vmem:[#allocation52_spill] sm:$0xff] %v2627_v17  ;;  %3466 = vst [vmem:[#allocation54_spill] sm:$0xff] %v2635_v58 }
 0x119   :  { %1427 = vperm.xlu0 %1775, %v2263_v7   ;;  %v2633_v48 = vpop.permute.xlu0 %1056  ;;  %3467 = vst [vmem:[#allocation55_spill] sm:$0xff] %v2639_v41  ;;  %3468 = vst [vmem:[#allocation56_spill] sm:$0xff] %v2648_v28  ;;  %v603_v23 = vmul.f32 %v588_v55, %v2643_v15 }
 0x11a   :  { %3465 = vst [vmem:[#allocation53_spill] sm:$0xff] %v2633_v48  ;;  %1111 = vperm.xlu1 %1765, %v2396_v45  }
 0x11b   :  { %v636_v37 = vpop.permute.xlu1 %635  ;;  %v1799_v4 = vpop.eup %1798 }
 0x11c   :  { %v650_v39 = vmul.f32 %v636_v37, %v2635_v58  ;;  %v652_v21 = vmul.f32 %v636_v37, %v2637_v56  ;;  %v653_v20 = vmul.f32 %v636_v37, %v2639_v41  ;;  %v651_v17 = vmul.f32 %v636_v37, %v2648_v28 }
 0x11d   :  { %1431 = vperm.xlu0 %1775, %v2338_v9   ;;  %v2651_v5 = vpop.permute.xlu0 %1066  ;;  %v619_v9 = vadd.f32 %v603_v23, %v2516_v2  ;;  %v2663_v55 = vmul.f32 %v1816_v47, %v1799_v4 }
 0x11e   :  { %3469 = vst [vmem:[#allocation57_spill] sm:$0xff] %v2651_v5  ;;  %v666_v48 = vadd.f32 %v650_v39, %v618_v54  ;;  %v668_v53 = vadd.f32 %v652_v21, %v620_v32  ;;  %v669_v52 = vadd.f32 %v653_v20, %v621_v33  ;;  %1767 = vset.pattern.permute.xlu1 %v3470_v13  ;;  %v1817_v54 = vld [vmem:[#allocation2 + $0x88] sm:$0xff]  ;;  %v1818_v32 = vld [vmem:[#allocation2 + $0x90] sm:$0xff] }
 0x11f   :  { %1167 = vperm.xlu1 %1767, %v2233_v6   ;;  %3473 = vst [vmem:[#allocation60_spill] sm:$0xff] %v2663_v55  ;;  %v2665_v33 = vmul.f32 %v1817_v54, %v1799_v4  ;;  %v2667_v39 = vmul.f32 %v1818_v32, %v1799_v4  ;;  %v1819_v6 = vld [vmem:[#allocation2 + $0x98] sm:$0xff]  ;;  %v667_v37 = vadd.f32 %v651_v17, %v619_v9 }
 0x120   :  { %v2657_v62 = vpop.permute.xlu1 %675  ;;  %v2669_v21 = vmul.f32 %v1819_v6, %v1799_v4  ;;  %v3477_v4 = vld [vmem:[#allocation13_spill] sm:$0xff] }
 0x121   :  { %3471 = vst [vmem:[#allocation58_spill] sm:$0xff] %v2657_v62  ;;  %1447 = vperm.xlu0 %1775, %v2396_v45   ;;  %v2660_v34 = vpop.permute.xlu0 %1076  ;;  %3474 = vst [vmem:[#allocation61_spill] sm:$0xff] %v2665_v33 }
 0x122   :  { %3472 = vst [vmem:[#allocation59_spill] sm:$0xff] %v2660_v34  ;;  %3475 = vst [vmem:[#allocation62_spill] sm:$0xff] %v2667_v39 }
 0x123   :  { %1171 = vperm.xlu1 %1767, %v2408_v51  }
 0x124   :  { %v684_v20 = vpop.permute.xlu1 %683 }
 0x125   :  { %v698_v5 = vmul.f32 %v684_v20, %v2663_v55  ;;  %v699_v2 = vmul.f32 %v684_v20, %v2665_v33  ;;  %v700_v23 = vmul.f32 %v684_v20, %v2667_v39  ;;  %v701_v47 = vmul.f32 %v684_v20, %v2669_v21  ;;  %v2676_v54 = vpop.permute.xlu0 %1086 }
 0x126   :  { %3476 = vst [vmem:[#allocation63_spill] sm:$0xff] %v2676_v54 }
 0x127   :  { %v714_v34 = vadd.f32 %v698_v5, %v666_v48  ;;  %v715_v32 = vadd.f32 %v699_v2, %v667_v37  ;;  %v716_v12 = vadd.f32 %v700_v23, %v668_v53  ;;  %v717_v63 = vadd.f32 %v701_v47, %v669_v52  ;;  %1179 = vperm.xlu1 %1767, %v3477_v4  }
 0x128   :  { %v2679_v6 = vpop.permute.xlu1 %687 }
 0x129   :  { %3478 = vst [vmem:[#allocation13_spill] sm:$0xff] %v2679_v6  ;;  %v2681_v17 = vpop.permute.xlu0 %1096 }
 0x12a   :  { %3479 = vst [vmem:[#allocation64_spill] sm:$0xff] %v2681_v17 }
 0x12b   :  { %1187 = vperm.xlu1 %1767, %v3460_v1  }
 0x12d   :  { %v2684_v9 = vpop.permute.xlu1 %727  ;;  %v2686_v46 = vpop.permute.xlu0 %1106 }
 0x12e   :  { %3480 = vst [vmem:[#allocation65_spill] sm:$0xff] %v2686_v46 }
 0x12f   :  { %1195 = vperm.xlu1 %1767, %v2256_v59  }
 0x131   :  { %v732_v20 = vpop.permute.xlu1 %731 }
 0x132   :  { %v746_v48 = vmul.f32 %v732_v20, %v2430_v18  ;;  %v747_v53 = vmul.f32 %v732_v20, %v2433_v25  ;;  %v748_v52 = vmul.f32 %v732_v20, %v2443_v31  ;;  %v749_v5 = vmul.f32 %v732_v20, %v2446_v26  ;;  %v2693_v37 = vpop.permute.xlu0 %915 }
 0x133   :  { %3481 = vst [vmem:[#allocation66_spill] sm:$0xff] %v2693_v37  ;;  %1203 = vperm.xlu1 %1767, %v2263_v7  }
 0x134   :  { %v762_v2 = vadd.f32 %v746_v48, %v714_v34  ;;  %v763_v23 = vadd.f32 %v747_v53, %v715_v32  ;;  %v764_v47 = vadd.f32 %v748_v52, %v716_v12  ;;  %v765_v17 = vadd.f32 %v749_v5, %v717_v63 }
 0x136   :  { %v2696_v54 = vpop.permute.xlu1 %771  ;;  %v2698_v46 = vpop.permute.xlu0 %927 }
 0x137   :  { %3482 = vst [vmem:[#allocation67_spill] sm:$0xff] %v2696_v54  ;;  %1211 = vperm.xlu1 %1767, %v3483_v29  }
 0x13a   :  { %v780_v6 = vpop.permute.xlu1 %779  ;;  %v2701_v62 = vpop.permute.xlu0 %1163 }
 0x13b   :  { %3484 = vst [vmem:[#allocation68_spill] sm:$0xff] %v2701_v62  ;;  %v794_v30 = vmul.f32 %v780_v6, %v2474_v43  ;;  %v795_v20 = vmul.f32 %v780_v6, %v2477_v42  ;;  %v796_v37 = vmul.f32 %v780_v6, %v2480_v38  ;;  %v797_v7 = vmul.f32 %v780_v6, %v2483_v0  ;;  %v3487_v6 = vld [vmem:[#allocation19_spill] sm:$0xff]  ;;  %v1820_v62 = vld [vmem:[#allocation2 + $0xe8] sm:$0xff] }
 0x13c   :  { %1768 = vset.pattern.permute.xlu1 %v3420_v14  ;;  %v202_v0 = vmax.f32 %v3487_v6, 1e-24  ;;  %v646_v43 = vmul.f32 %v2630_v3, %v2635_v58  ;;  %v697_v58 = vmul.f32 %v2384_v40, %v2669_v21 }
 0x13d   :  { %1275 = vperm.xlu1 %1768, %v2308_v8   ;;  %v810_v63 = vadd.f32 %v794_v30, %v762_v2  ;;  %v811_v12 = vadd.f32 %v795_v20, %v763_v23  ;;  %v812_v34 = vadd.f32 %v796_v37, %v764_v47  ;;  %v813_v32 = vadd.f32 %v797_v7, %v765_v17  ;;  %v3488_v7 = vld [vmem:[#allocation18_spill] sm:$0xff] }
 0x13e   :  { %v2709_v48 = vpop.permute.xlu1 %783  ;;  %v2711_v53 = vpop.permute.xlu0 %1175  ;;  %v2721_v30 = vmul.f32 %v1820_v62, %v2529_v19  ;;  %1800 = vrsqrt.f32 %v202_v0 }
 0x13f   :  { %3485 = vst [vmem:[#allocation69_spill] sm:$0xff] %v2709_v48  ;;  %3486 = vst [vmem:[#allocation70_spill] sm:$0xff] %v2711_v53  ;;  %v204_v53 = vmax.f32 %v3488_v7, 1e-24 }
 0x141   :  { %1291 = vperm.xlu1 %1768, %v3477_v4   ;;  %1802 = vrsqrt.f32 %v204_v53 }
 0x142   :  { %v2714_v52 = vpop.permute.xlu0 %1183 }
 0x143   :  { %v2716_v5 = vpop.permute.xlu1 %823 }
 0x145   :  { %1295 = vperm.xlu1 %1768, %v3442_v57  }
 0x146   :  { %v2723_v37 = vpop.permute.xlu0 %1191 }
 0x147   :  { %v828_v17 = vpop.permute.xlu1 %827 }
 0x148   :  { %v842_v2 = vmul.f32 %v828_v17, %v2538_v16  ;;  %v843_v23 = vmul.f32 %v828_v17, %v2721_v30  ;;  %v844_v47 = vmul.f32 %v828_v17, %v2542_v11  ;;  %v845_v20 = vmul.f32 %v828_v17, %v2546_v49 }
 0x149   :  { %1283 = vperm.xlu1 %1768, %v2408_v51   ;;  %v3369_v17 = vlaneseq }
 0x14a   :  { %v2731_v6 = vpop.permute.xlu0 %1199  ;;  %v2733_v19 = vadd.f32 %v842_v2, %v810_v63  ;;  %v2735_v62 = vadd.f32 %v843_v23, %v811_v12  ;;  %v2737_v48 = vadd.f32 %v844_v47, %v812_v34  ;;  %v2739_v38 = vadd.f32 %v845_v20, %v813_v32  ;;  %v1801_v12 = vpop.eup %1800  ;;  %v1821_v2 = vld [vmem:[%s3315_s1 + $0x4] sm:$0xf] }
 0x14b   :  { %v2752_v34 = vshrl.u32 %v3369_v17, 7  ;;  %v2762_v23 = vmul.f32 %v1821_v2, %v1801_v12  ;;  %v1803_v20 = vpop.eup %1802  ;;  %v3499_v17 = vld [vmem:[#allocation16_spill] sm:$0xff]  ;;  %v1822_v2 = vld [vmem:[%s3315_s1 + $0xc] sm:$0xf] }
 0x14c   :  { %3489 = vst [vmem:[#allocation19_spill] sm:$0xff] %v2733_v19  ;;  %3490 = vst [vmem:[#allocation18_spill] sm:$0xff] %v2735_v62  ;;  %v2742_v42 = vpop.permute.xlu1 %872  ;;  %v201_v62 = vmax.f32 %v3499_v17, 1e-24  ;;  %v2782_v19 = vmul.f32 %v1822_v2, %v1803_v20 }
 0x14d   :  { %3491 = vst [vmem:[#allocation71_spill] sm:$0xff] %v2737_v48  ;;  %3492 = vst [vmem:[#allocation72_spill] sm:$0xff] %v2739_v38  ;;  %1299 = vperm.xlu1 %1768, %v3460_v1   ;;  %v3497_v1 = vld [vmem:[#allocation15_spill] sm:$0xff]  ;;  %v2767_v7 = vsub.s32 0, %v2752_v34  ;;  %v694_v48 = vmul.f32 %v2384_v40, %v2663_v55  ;;  %v695_v38 = vmul.f32 %v2384_v40, %v2665_v33 }
 0x14e   :  { %3493 = vst [vmem:[#allocation73_spill] sm:$0xff] %v2742_v42  ;;  %v2744_v54 = vpop.permute.xlu0 %1207  ;;  %3496 = vst [vmem:[#allocation76_spill] sm:$0xff] %v2752_v34  ;;  %v203_v53 = vmax.f32 %v3497_v1, 1e-24  ;;  %v2774_v1 = vsub.s32 2, %v2752_v34  ;;  %v647_v33 = vmul.f32 %v2630_v3, %v2648_v28 }
 0x14f   :  { %3494 = vst [vmem:[#allocation74_spill] sm:$0xff] %v2744_v54  ;;  %v897_v12 = vrot.slane %v2762_v23, %v2767_v7 }
 0x150   :  { %v2747_v0 = vpop.permute.xlu1 %882  ;;  %1804 = vrsqrt.f32 %v203_v53 }
 0x151   :  { %1311 = vperm.xlu1 %1768, %v3456_v50   ;;  %1806 = vrsqrt.f32 %v201_v62 }
 0x152   :  { %v2749_v63 = vpop.permute.xlu0 %1215 }
 0x153   :  { %3495 = vst [vmem:[#allocation75_spill] sm:$0xff] %v2749_v63  ;;  %v696_v63 = vmul.f32 %v2384_v40, %v2667_v39  ;;  %v648_v39 = vmul.f32 %v2630_v3, %v2637_v56 }
 0x154   :  { %v2755_v32 = vpop.permute.xlu1 %887 }
 0x155   :  { %1770 = vset.pattern.permute.xlu1 %v3470_v13  ;;  %v2770_v13 = vsub.s32 1, %v2752_v34 }
 0x156   :  { %1223 = vperm.xlu1 %1770, %v2396_v45   ;;  %v2764_v47 = vpop.permute.xlu0 %1219 }
 0x157   :  { %3498 = vst [vmem:[#allocation15_spill] sm:$0xff] %v2764_v47  ;;  %v937_v17 = vrot.slane %v2762_v23, %v2770_v13  ;;  %v977_v47 = vrot.slane %v2762_v23, %v2774_v1 }
 0x159   :  { %v920_v45 = vpop.permute.xlu1 %919 }
 0x15a   :  { %1771 = vset.pattern.permute.xlu1 %v3420_v14  ;;  %v947_v42 = vmul.f32 %v937_v17, %v920_v45  ;;  %v907_v45 = vmul.f32 %v897_v12, %v2601_v27  ;;  %v3500_v17 = vld [vmem:[#allocation38_spill] sm:$0xff]  ;;  %v744_v27 = vmul.f32 %v2684_v9, %v2443_v31  ;;  %v3501_v12 = vmov 3  }
 0x15b   :  { %1303 = vperm.xlu1 %1771, %v3453_v44   ;;  %v584_v53 = vpop.permute.xlu0 %583 }
 0x15c   :  { %v598_v20 = vmul.f32 %v584_v53, %v2569_v35  ;;  %v599_v2 = vmul.f32 %v584_v53, %v2643_v15  ;;  %v600_v44 = vmul.f32 %v584_v53, %v2572_v22  ;;  %v601_v55 = vmul.f32 %v584_v53, %v2579_v36 }
 0x15d   :  { %v2803_v50 = vpop.permute.xlu1 %923  ;;  %v649_v36 = vmul.f32 %v2630_v3, %v2639_v41 }
 0x15e   :  { %v614_v35 = vadd.f32 %v598_v20, %v2486_v60  ;;  %v615_v54 = vadd.f32 %v599_v2, %v2488_v10  ;;  %v616_v22 = vadd.f32 %v600_v44, %v2490_v24  ;;  %v617_v53 = vadd.f32 %v601_v55, %v3500_v17 }
 0x15f   :  { %1323 = vperm.xlu1 %1771, %v3483_v29   ;;  %v960_v28 = vpop.permute.xlu0 %959  ;;  %v742_v60 = vmul.f32 %v2684_v9, %v2430_v18  ;;  %v743_v24 = vmul.f32 %v2684_v9, %v2433_v25  ;;  %v951_v44 = vadd.f32 %v947_v42, %v907_v45 }
 0x160   :  { %v662_v20 = vadd.f32 %v646_v43, %v614_v35  ;;  %v663_v10 = vadd.f32 %v647_v33, %v615_v54  ;;  %v664_v2 = vadd.f32 %v648_v39, %v616_v22  ;;  %v665_v29 = vadd.f32 %v649_v36, %v617_v53  ;;  %v3504_v36 = vld [vmem:[#allocation40_spill] sm:$0xff] }
 0x161   :  { %v987_v40 = vmul.f32 %v977_v47, %v960_v28  ;;  %v745_v43 = vmul.f32 %v2684_v9, %v2446_v26  ;;  %v1805_v28 = vpop.eup %1804  ;;  %v905_v22 = vrot.slane %v2782_v19, %v2767_v7  ;;  %v839_v9 = vmul.f32 %v2716_v5, %v2721_v30 }
 0x162   :  { %v2824_v3 = vpop.permute.xlu1 %955  ;;  %v710_v55 = vadd.f32 %v694_v48, %v662_v20  ;;  %v711_v17 = vadd.f32 %v695_v38, %v663_v10  ;;  %v712_v41 = vadd.f32 %v696_v63, %v664_v2  ;;  %v713_v42 = vadd.f32 %v697_v58, %v665_v29  ;;  %v3505_v58 = vld [vmem:[#allocation41_spill] sm:$0xff]  ;;  %v3506_v10 = vld [vmem:[#allocation42_spill] sm:$0xff] }
 0x163   :  { %1772 = vset.pattern.permute.xlu1 %v3501_v12  ;;  %v991_v33 = vadd.f32 %v987_v40, %v951_v44  ;;  %v2829_v39 = vpop.permute.xlu0 %1279  ;;  %v838_v38 = vmul.f32 %v2716_v5, %v2538_v16  ;;  %v945_v53 = vrot.slane %v2782_v19, %v2770_v13  ;;  %v1823_v44 = vld [vmem:[%s3315_s1 + $0x8] sm:$0xf] }
 0x164   :  { %1387 = vperm.xlu1 %1772, %v2308_v8   ;;  %3502 = vst [vmem:[#allocation16_spill] sm:$0xff] %v2829_v39  ;;  %v758_v54 = vadd.f32 %v742_v60, %v710_v55  ;;  %v759_v47 = vadd.f32 %v743_v24, %v711_v17  ;;  %v760_v35 = vadd.f32 %v744_v27, %v712_v41  ;;  %v3503_v8 = vld [vmem:[#allocation39_spill] sm:$0xff] }
 0x165   :  { %v761_v48 = vadd.f32 %v745_v43, %v713_v42  ;;  %v840_v41 = vmul.f32 %v2716_v5, %v2542_v11  ;;  %v909_v60 = vmul.f32 %v905_v22, %v2755_v32  ;;  %v841_v24 = vmul.f32 %v2716_v5, %v2546_v49  ;;  %v3548_v11 = vld [vmem:[#allocation48_spill] sm:$0xff] }
 0x166   :  { %v964_v63 = vpop.permute.xlu1 %963  ;;  %v806_v45 = vadd.f32 %v3503_v8, %v758_v54  ;;  %v807_v29 = vadd.f32 %v3504_v36, %v759_v47  ;;  %v808_v62 = vadd.f32 %v3505_v58, %v760_v35  ;;  %v211_v40 = vmul.f32 %v1823_v44, %v1805_v28 }
 0x167   :  { %v2846_v20 = vpop.permute.xlu0 %1307  ;;  %v809_v2 = vadd.f32 %v3506_v10, %v761_v48  ;;  %v985_v32 = vrot.slane %v2782_v19, %v2774_v1  ;;  %v2870_v35 = vsub.s32 3, %v2752_v34 }
 0x168   :  { %1403 = vperm.xlu1 %1772, %v3477_v4   ;;  %v2854_v27 = vadd.f32 %v838_v38, %v806_v45  ;;  %v2856_v55 = vadd.f32 %v839_v9, %v807_v29  ;;  %v2858_v17 = vadd.f32 %v840_v41, %v808_v62  ;;  %v949_v4 = vmul.f32 %v945_v53, %v2698_v46  ;;  %v1807_v46 = vpop.eup %1806  ;;  %v3512_v62 = vld [vmem:[#allocation20_spill] sm:$0xff] }
 0x169   :  { %v2863_v43 = vadd.f32 %v841_v24, %v809_v2  ;;  %v941_v28 = vrot.slane %v211_v40, %v2770_v13  ;;  %v901_v38 = vrot.slane %v211_v40, %v2767_v7  ;;  %v981_v48 = vrot.slane %v211_v40, %v2774_v1 }
 0x16a   :  { %3507 = vst [vmem:[#allocation38_spill] sm:$0xff] %v2854_v27  ;;  %3508 = vst [vmem:[#allocation39_spill] sm:$0xff] %v2856_v55  ;;  %v968_v42 = vpop.permute.xlu1 %967  ;;  %v953_v5 = vadd.f32 %v949_v4, %v909_v60  ;;  %v1017_v8 = vrot.slane %v2762_v23, %v2870_v35  ;;  %v3541_v55 = vld [vmem:[#allocation56_spill] sm:$0xff] }
 0x16b   :  { %3509 = vst [vmem:[#allocation40_spill] sm:$0xff] %v2858_v17  ;;  %3510 = vst [vmem:[#allocation41_spill] sm:$0xff] %v2863_v43  ;;  %v989_v54 = vmul.f32 %v985_v32, %v968_v42  ;;  %v2866_v47 = vpop.permute.xlu0 %1287  ;;  %v948_v9 = vmul.f32 %v941_v28, %v2803_v50  ;;  %v908_v36 = vmul.f32 %v901_v38, %v2747_v0  ;;  %v3516_v0 = vld [vmem:[#allocation26_spill] sm:$0xff]  ;;  %v3519_v32 = vld [vmem:[#allocation28_spill] sm:$0xff] }
 0x16c   :  { %1407 = vperm.xlu1 %1772, %v3442_v57   ;;  %3511 = vst [vmem:[#allocation42_spill] sm:$0xff] %v2866_v47  ;;  %v988_v29 = vmul.f32 %v981_v48, %v964_v63  ;;  %v1021_v50 = vrot.slane %v211_v40, %v2870_v35  ;;  %v3517_v63 = vld [vmem:[#allocation46_spill] sm:$0xff]  ;;  %v3520_v42 = vld [vmem:[#allocation29_spill] sm:$0xff]  ;;  %v3542_v17 = vld [vmem:[#allocation55_spill] sm:$0xff] }
 0x16d   :  { %v2872_v22 = vadd.f32 %v989_v54, %v953_v5  ;;  %v952_v41 = vadd.f32 %v948_v9, %v908_v36  ;;  %v499_v24 = vmul.f32 %v3517_v63, %v3516_v0  ;;  %v547_v5 = vmul.f32 %v3520_v42, %v3519_v32  ;;  %v3534_v42 = vld [vmem:[#allocation73_spill] sm:$0xff]  ;;  %v3537_v0 = vld [vmem:[#allocation62_spill] sm:$0xff] }
 0x16f   :  { %v1000_v57 = vpop.permute.xlu1 %999  ;;  %v1316_v45 = vpop.permute.xlu0 %1315  ;;  %v992_v2 = vadd.f32 %v988_v29, %v952_v41 }
 0x170   :  { %1773 = vset.pattern.permute.xlu1 %v3420_v14  ;;  %v1027_v58 = vmul.f32 %v1017_v8, %v1000_v57  ;;  %v3524_v8 = vld [vmem:[#allocation74_spill] sm:$0xff] }
 0x171   :  { %1331 = vperm.xlu1 %1773, %v3512_v62  }
 0x172   :  { %v2882_v53 = vadd.f32 %v1027_v58, %v991_v33  ;;  %v1824_v33 = vld [vmem:[%s3315_s1] sm:$0xf]  ;;  %s1884_s1 = smov [#allocation5]  }
 0x173   :  { %v1004_v60 = vpop.permute.xlu1 %1003  ;;  %v2885_v10 = vpop.permute.xlu0 %1327  ;;  %v2897_v44 = vmul.f32 %v1824_v33, %v1807_v46  ;;  %v3532_v33 = vld [vmem:[#allocation60_spill] sm:$0xff]  ;;  %s1722_s15 = sshll.u32 %s1884_s1, 4  ;;  %s1723_s15 = int_to_ptr.vmem [resolvable:$true] %s1722_s15 }
 0x174   :  { %3513 = vst [vmem:[#allocation20_spill] sm:$0xff] %v2882_v53  ;;  %3514 = vst [vmem:[#allocation77_spill] sm:$0xff] %v2885_v10  ;;  %v2889_v14 = vrot.slane %v2882_v53, %v2770_v13  ;;  %v1028_v23 = vmul.f32 %v1021_v50, %v1004_v60  ;;  %v3529_v50 = vld [vmem:[#allocation45_spill] sm:$0xff]  ;;  %s1847_s16 = scalar_lea.vmem %s1723_s15, 16  ;;  %s1851_s17 = scalar_lea.vmem %s1723_s15, 32 }
 0x175   :  { %1774 = vset.pattern.permute.xlu1 %v3501_v12  ;;  %v933_v38 = vrot.slane %v2897_v44, %v2770_v13  ;;  %v893_v36 = vrot.slane %v2897_v44, %v2767_v7  ;;  %v595_v60 = vmul.f32 %v3529_v50, %v2643_v15  ;;  %v3536_v50 = vld [vmem:[#allocation61_spill] sm:$0xff]  ;;  %p1848_p8 = scmp.ne.s32.totalorder %s1723_s15, %s1847_s16  ;;  %p1852_p9 = scmp.lt.s32.totalorder %s1723_s15, %s1723_s15 }
 0x176   :  { %3515 = vst [vmem:[#allocation78_spill] sm:$0xff] %v2889_v14  ;;  %1395 = vperm.xlu1 %1774, %v2408_v51   ;;  %v2900_v40 = vadd.f32 %v1028_v23, %v992_v2  ;;  %v2904_v4 = vmul.f32 %v2889_v14, %v2714_v52  ;;  %v2908_v12 = vmul.f32 %v2889_v14, %v2723_v37  ;;  %p1853_p10 = scmp.lt.s32.totalorder %s1851_s17, %s1847_s16 }
 0x177   :  { %v1320_v54 = vpop.permute.xlu0 %1319  ;;  %v563_v52 = vadd.f32 %v547_v5, %v499_v24  ;;  %v607_v37 = vmul.f32 %v2606_v61, %v2643_v15  ;;  %v1013_v23 = vrot.slane %v2897_v44, %v2870_v35  ;;  %v3530_v15 = vld [vmem:[#allocation12_spill] sm:$0xff]  ;;  %v906_v5 = vmul.f32 %v893_v36, %v3534_v42  ;;  %v3539_v36 = vld [vmem:[#allocation66_spill] sm:$0xff] }
 0x178   :  { %3518 = vst [vmem:[#allocation26_spill] sm:$0xff] %v2900_v40  ;;  %v2914_v28 = vrot.slane %v2900_v40, %v2770_v13  ;;  %v2918_v51 = vrot.slane %v2900_v40, %v2774_v1  ;;  %v2920_v46 = vpop.permute.xlu1 %1036  ;;  %v2971_v63 = vmul.f32 %v3530_v15, %v2721_v30  ;;  %v3531_v24 = vld [vmem:[#allocation24_spill] sm:$0xff]  ;;  %v3538_v15 = vld [vmem:[#allocation13_spill] sm:$0xff]  ;;  %p1854_p11 = por %p1853_p10, %p1852_p9 }
 0x179   :  { %v703_v34 = vmul.f32 %v3538_v15, %v3536_v50 }
 0x17a   :  { %3521 = vst [vmem:[#allocation46_spill] sm:$0xff] %v2914_v28  ;;  %3522 = vst [vmem:[#allocation28_spill] sm:$0xff] %v2918_v51  ;;  %1419 = vperm.xlu1 %1774, %v2256_v59   ;;  %v2928_v9 = vmul.f32 %v2918_v51, %v1320_v54  ;;  %v2932_v48 = vmul.f32 %v2914_v28, %v2731_v6  ;;  %v2936_v57 = vmul.f32 %v2914_v28, %v3524_v8  ;;  %v3528_v6 = vld [vmem:[#allocation27_spill] sm:$0xff]  ;;  %p1855_p12 = pnand %p1854_p11, %p1848_p8 }
 0x17b   :  { %v973_v59 = vrot.slane %v2897_v44, %v2774_v1  ;;  %v2942_v29 = vpop.permute.xlu0 %1335  ;;  %v2945_v61 = vmul.f32 %v2918_v51, %v1316_v45  ;;  %v2949_v58 = vmul.f32 %v2918_v51, %v2846_v20  ;;  %v738_v41 = vmul.f32 %v3528_v6, %v2430_v18  ;;  %v3533_v44 = vld [vmem:[#allocation58_spill] sm:$0xff] }
 0x17c   :  { %3523 = vst [vmem:[#allocation29_spill] sm:$0xff] %v2928_v9  ;;  %3525 = vst [vmem:[#allocation74_spill] sm:$0xff] %v2936_v57  ;;  %v2955_v2 = vpop.permute.xlu1 %1046  ;;  %v739_v45 = vmul.f32 %v3528_v6, %v2433_v25  ;;  %v740_v20 = vmul.f32 %v3528_v6, %v2443_v31  ;;  %v2967_v18 = vmul.f32 %v3528_v6, %v2446_v26  ;;  %v3535_v25 = vld [vmem:[#allocation8_spill] sm:$0xff] }
 0x17d   :  { %3526 = vst [vmem:[#allocation79_spill] sm:$0xff] %v2945_v61  ;;  %3527 = vst [vmem:[#allocation80_spill] sm:$0xff] %v2949_v58  ;;  %v690_v32 = vmul.f32 %v3533_v44, %v3532_v33  ;;  %v611_v54 = vadd.f32 %v595_v60, %v563_v52  ;;  %v623_v8 = vadd.f32 %v607_v37, %v3535_v25  ;;  %v3540_v25 = vld [vmem:[#allocation54_spill] sm:$0xff]  ;;  %v3547_v58 = vld [vmem:[#allocation47_spill] sm:$0xff] }
 0x17e   :  { %1423 = vperm.xlu1 %1774, %v3531_v24   ;;  %v691_v31 = vmul.f32 %v3533_v44, %v3536_v50  ;;  %v692_v26 = vmul.f32 %v3533_v44, %v3537_v0  ;;  %v693_v6 = vmul.f32 %v3533_v44, %v2669_v21  ;;  %v702_v24 = vmul.f32 %v3538_v15, %v3532_v33  ;;  %v3543_v33 = vld [vmem:[#allocation21_spill] sm:$0xff]  ;;  %v3544_v50 = vld [vmem:[#allocation34_spill] sm:$0xff] }
 0x17f   :  { %v704_v52 = vmul.f32 %v3538_v15, %v3537_v0  ;;  %v946_v37 = vmul.f32 %v933_v38, %v3539_v36  ;;  %v986_v60 = vmul.f32 %v973_v59, %v2824_v3  ;;  %v705_v0 = vmul.f32 %v3538_v15, %v2669_v21  ;;  %v3545_v38 = vld [vmem:[#allocation67_spill] sm:$0xff] }
 0x180   :  { %v628_v42 = vpop.permute.xlu0 %627  ;;  %v786_v36 = vmul.f32 %v3545_v38, %v3544_v50  ;;  %v3546_v3 = vld [vmem:[#allocation35_spill] sm:$0xff]  ;;  %v3012_v21 = vrot.slane %v2882_v53, %v2767_v7  ;;  %v3016_v15 = vrot.slane %v2900_v40, %v2767_v7 }
 0x181   :  { %v642_v43 = vmul.f32 %v628_v42, %v3540_v25  ;;  %v643_v27 = vmul.f32 %v628_v42, %v3541_v55  ;;  %v644_v44 = vmul.f32 %v628_v42, %v2637_v56  ;;  %v645_v51 = vmul.f32 %v628_v42, %v3542_v17  ;;  %v2997_v14 = vpop.permute.xlu1 %1051  ;;  %v3549_v42 = vld [vmem:[#allocation49_spill] sm:$0xff] }
 0x182   :  { %1399 = vperm.xlu1 %1774, %v3543_v33   ;;  %v787_v59 = vmul.f32 %v3545_v38, %v3546_v3  ;;  %v950_v61 = vadd.f32 %v946_v37, %v906_v5  ;;  %v3550_v33 = vld [vmem:[#allocation36_spill] sm:$0xff] }
 0x183   :  { %v658_v28 = vadd.f32 %v642_v43, %v3547_v58  ;;  %v659_v39 = vadd.f32 %v643_v27, %v611_v54  ;;  %v660_v49 = vadd.f32 %v644_v44, %v3548_v11  ;;  %v661_v9 = vadd.f32 %v645_v51, %v3549_v42  ;;  %v3551_v11 = vld [vmem:[#allocation23_spill] sm:$0xff] }
 0x184   :  { %v788_v10 = vmul.f32 %v3545_v38, %v3550_v33  ;;  %v990_v47 = vadd.f32 %v986_v60, %v950_v61  ;;  %v640_v57 = vpop.permute.xlu0 %639 }
 0x185   :  { %v706_v5 = vadd.f32 %v690_v32, %v658_v28  ;;  %v707_v43 = vadd.f32 %v691_v31, %v659_v39  ;;  %v708_v27 = vadd.f32 %v692_v26, %v660_v49  ;;  %v709_v58 = vadd.f32 %v693_v6, %v661_v9  ;;  %v1062_v51 = vpop.permute.xlu1 %1061  ;;  %v3552_v28 = vld [vmem:[#allocation50_spill] sm:$0xff]  ;;  %v3553_v9 = vld [vmem:[#allocation51_spill] sm:$0xff]  ;;  %v3554_v31 = vld [vmem:[#allocation52_spill] sm:$0xff] }
 0x186   :  { %1415 = vperm.xlu1 %1774, %v3551_v11   ;;  %v654_v54 = vmul.f32 %v640_v57, %v3540_v25  ;;  %v655_v61 = vmul.f32 %v640_v57, %v3541_v55  ;;  %v656_v37 = vmul.f32 %v640_v57, %v2637_v56  ;;  %v657_v60 = vmul.f32 %v640_v57, %v3542_v17  ;;  %v3555_v56 = vld [vmem:[#allocation17_spill] sm:$0xff] }
 0x187   :  { %v1135_v44 = vmul.f32 %v3012_v21, %v1062_v51  ;;  %v755_v42 = vadd.f32 %v739_v45, %v707_v43  ;;  %v754_v53 = vadd.f32 %v738_v41, %v706_v5  ;;  %v756_v40 = vadd.f32 %v740_v20, %v708_v27 }
 0x188   :  { %v670_v39 = vadd.f32 %v654_v54, %v3552_v28  ;;  %v671_v49 = vadd.f32 %v655_v61, %v623_v8  ;;  %v672_v32 = vadd.f32 %v656_v37, %v3553_v9  ;;  %v673_v26 = vadd.f32 %v657_v60, %v3554_v31  ;;  %v996_v6 = vpop.permute.xlu0 %995  ;;  %v3560_v61 = vld [vmem:[#allocation25_spill] sm:$0xff]  ;;  %v3562_v60 = vld [vmem:[#allocation10_spill] sm:$0xff]  ;;  %v3563_v9 = vld [vmem:[#allocation68_spill] sm:$0xff] }
 0x189   :  { %v3028_v25 = vadd.f32 %v2904_v4, %v1135_v44  ;;  %v1026_v55 = vmul.f32 %v1013_v23, %v996_v6  ;;  %v1072_v17 = vpop.permute.xlu1 %1071  ;;  %v803_v57 = vadd.f32 %v787_v59, %v755_v42  ;;  %v802_v11 = vadd.f32 %v786_v36, %v754_v53  ;;  %v3556_v4 = vld [vmem:[#allocation9_spill] sm:$0xff]  ;;  %v3557_v53 = vld [vmem:[#allocation30_spill] sm:$0xff] }
 0x18a   :  { %1435 = vperm.xlu1 %1774, %v3555_v56   ;;  %v718_v45 = vadd.f32 %v702_v24, %v670_v39  ;;  %v719_v41 = vadd.f32 %v703_v34, %v671_v49  ;;  %v3031_v20 = vadd.f32 %v704_v52, %v672_v32  ;;  %v721_v5 = vadd.f32 %v705_v0, %v673_v26  ;;  %v3558_v34 = vld [vmem:[#allocation31_spill] sm:$0xff]  ;;  %v3564_v31 = vld [vmem:[#allocation37_spill] sm:$0xff] }
 0x18b   :  { %v3033_v8 = vadd.f32 %v1026_v55, %v990_v47  ;;  %v1137_v43 = vmul.f32 %v3012_v21, %v1072_v17  ;;  %v3037_v27 = vadd.f32 %v2971_v63, %v803_v57  ;;  %v3040_v51 = vadd.f32 %v3556_v4, %v802_v11  ;;  %v3567_v57 = vld [vmem:[#allocation75_spill] sm:$0xff]  ;;  %v3568_v11 = vld [vmem:[#allocation65_spill] sm:$0xff] }
 0x18c   :  { %v1008_v23 = vpop.permute.xlu0 %1007  ;;  %v804_v54 = vadd.f32 %v788_v10, %v756_v40  ;;  %v757_v59 = vadd.f32 %v2967_v18, %v709_v58  ;;  %v766_v24 = vadd.f32 %v3557_v53, %v718_v45  ;;  %v767_v52 = vadd.f32 %v3558_v34, %v719_v41  ;;  %v3561_v58 = vld [vmem:[#allocation43_spill] sm:$0xff]  ;;  %v3569_v45 = vld [vmem:[#allocation74_spill] sm:$0xff] }
 0x18d   :  { %v3047_v47 = vrot.slane %v3033_v8, %v2767_v7  ;;  %v3050_v0 = vadd.f32 %v2908_v12, %v1137_v43  ;;  %v3559_v63 = vrot.slane %v2782_v19, %v2870_v35  ;;  %v1082_v10 = vpop.permute.xlu1 %1081  ;;  %v3059_v18 = vrot.slane %v3033_v8, %v2770_v13  ;;  %v3570_v4 = vld [vmem:[#allocation15_spill] sm:$0xff]  ;;  %v3571_v53 = vld [vmem:[#allocation42_spill] sm:$0xff] }
 0x18e   :  { %1439 = vperm.xlu1 %1774, %v3560_v61   ;;  %v1139_v40 = vmul.f32 %v3016_v15, %v1082_v10  ;;  %v3062_v37 = vadd.f32 %v3561_v58, %v804_v54  ;;  %v846_v12 = vmul.f32 %v3562_v60, %v2538_v16  ;;  %v3068_v44 = vrot.slane %v3033_v8, %v2774_v1  ;;  %v3573_v58 = vld [vmem:[#allocation29_spill] sm:$0xff] }
 0x18f   :  { %v1029_v36 = vmul.f32 %v3559_v63, %v1008_v23  ;;  %v3075_v42 = vmul.f32 %v3047_v47, %v2955_v2  ;;  %v847_v28 = vmul.f32 %v3562_v60, %v2721_v30  ;;  %v1130_v16 = vmul.f32 %v3047_v47, %v2920_v46 }
 0x190   :  { %v3080_v39 = vadd.f32 %v2932_v48, %v1139_v40  ;;  %v1392_v49 = vpop.permute.xlu0 %1391  ;;  %v1242_v32 = vmul.f32 %v3059_v18, %v3563_v9  ;;  %v789_v2 = vmul.f32 %v3545_v38, %v3564_v31 }
 0x191   :  { %v3071_v19 = vadd.f32 %v1029_v36, %v2872_v22  ;;  %v1133_v22 = vmul.f32 %v3047_v47, %v2997_v14  ;;  %v1092_v46 = vpop.permute.xlu1 %1091  ;;  %v3565_v14 = vld [vmem:[#allocation69_spill] sm:$0xff] }
 0x192   :  { %1443 = vperm.xlu1 %1774, %v3512_v62   ;;  %v798_v6 = vmul.f32 %v3565_v14, %v3544_v50  ;;  %v1141_v38 = vmul.f32 %v3016_v15, %v1092_v46  ;;  %v3106_v55 = vadd.f32 %v1242_v32, %v1130_v16  ;;  %v799_v17 = vmul.f32 %v3565_v14, %v3546_v3  ;;  %v3572_v36 = vld [vmem:[#allocation77_spill] sm:$0xff] }
 0x193   :  { %v3092_v26 = vrot.slane %v3071_v19, %v2770_v13  ;;  %v3096_v30 = vrot.slane %v3071_v19, %v2774_v1  ;;  %v3101_v48 = vrot.slane %v3071_v19, %v2767_v7  ;;  %v3566_v13 = vld [vmem:[#allocation70_spill] sm:$0xff]  ;;  %v1357_v3 = vmul.f32 %v3068_v44, %v3571_v53 }
 0x194   :  { %v1245_v56 = vmul.f32 %v3059_v18, %v3566_v13  ;;  %v1269_v41 = vadd.f32 %v3569_v45, %v1141_v38  ;;  %v3121_v43 = vpop.permute.xlu0 %1411  ;;  %v801_v34 = vmul.f32 %v3565_v14, %v3564_v31  ;;  %v814_v10 = vadd.f32 %v798_v6, %v766_v24  ;;  %v3575_v13 = vld [vmem:[#allocation33_spill] sm:$0xff] }
 0x195   :  { %v1255_v62 = vmul.f32 %v3092_v26, %v3567_v57  ;;  %v3116_v7 = vmul.f32 %v3096_v30, %v2942_v29  ;;  %v1144_v50 = vmul.f32 %v3101_v48, %v3568_v11  ;;  %v1256_v23 = vmul.f32 %v3092_v26, %v3570_v4  ;;  %v1102_v63 = vpop.permute.xlu1 %1101 }
 0x196   :  { %v1261_v54 = vadd.f32 %v1245_v56, %v1133_v22  ;;  %v805_v29 = vadd.f32 %v789_v2, %v757_v59  ;;  %v1367_v61 = vmul.f32 %v3096_v30, %v3572_v36  ;;  %v1143_v40 = vmul.f32 %v3101_v48, %v1102_v63  ;;  %v3574_v22 = vld [vmem:[#allocation44_spill] sm:$0xff] }
 0x197   :  { %v1381_v16 = vadd.f32 %v3573_v58, %v1269_v41  ;;  %v3133_v9 = vadd.f32 %v1256_v23, %v1144_v50  ;;  %v3140_v38 = vadd.f32 %v846_v12, %v814_v10  ;;  %v815_v31 = vadd.f32 %v799_v17, %v767_v52  ;;  %v3576_v56 = vld [vmem:[#allocation32_spill] sm:$0xff]  ;;  %v3577_v41 = vld [vmem:[#allocation22_spill] sm:$0xff]  ;;  %v3578_v17 = vld [vmem:[#allocation11_spill] sm:$0xff] }
 0x198   :  { %v3135_v32 = vadd.f32 %v1357_v3, %v1261_v54  ;;  %v3138_v46 = vadd.f32 %v3574_v22, %v805_v29  ;;  %v769_v59 = vadd.f32 %v3575_v13, %v721_v5  ;;  %v800_v2 = vmul.f32 %v3565_v14, %v3550_v33  ;;  %v1428_v6 = vpop.permute.xlu0 %1427  ;;  %v3579_v14 = vld [vmem:[#allocation26_spill] sm:$0xff]  ;;  %v3581_v36 = vld [vmem:[#allocation16_spill] sm:$0xff] }
 0x199   :  { %v1271_v24 = vadd.f32 %v1255_v62, %v1143_v40  ;;  %v768_v57 = vadd.f32 %v3576_v56, %v3031_v20  ;;  %v1112_v11 = vpop.permute.xlu1 %1111  ;;  %v3147_v50 = vadd.f32 %v847_v28, %v815_v31  ;;  %v849_v4 = vmul.f32 %v3562_v60, %v3577_v41  ;;  %v3582_v40 = vld [vmem:[#allocation72_spill] sm:$0xff]  ;;  %v3584_v41 = vld [vmem:[#allocation46_spill] sm:$0xff] }
 0x19a   :  { %v817_v45 = vadd.f32 %v801_v34, %v769_v59  ;;  %v3152_v12 = vmul.f32 %v3101_v48, %v1112_v11  ;;  %v848_v33 = vmul.f32 %v3562_v60, %v3578_v17  ;;  %v3160_v62 = vrot.slane %v3579_v14, %v2870_v35  ;;  %v3580_v34 = vld [vmem:[#allocation14_spill] sm:$0xff]  ;;  %v3583_v11 = vld [vmem:[#allocation59_spill] sm:$0xff] }
 0x19b   :  { %v3154_v52 = vadd.f32 %v1367_v61, %v1271_v24  ;;  %v816_v5 = vadd.f32 %v800_v2, %v768_v57  ;;  %v1131_v63 = vmul.f32 %v3047_v47, %v3580_v34  ;;  %v3172_v60 = vrot.slane %v3033_v8, %v2870_v35  ;;  %v3585_v17 = vld [vmem:[#allocation63_spill] sm:$0xff]  ;;  %v3588_v34 = vld [vmem:[#allocation64_spill] sm:$0xff] }
 0x19c   :  { %v3162_v20 = vadd.f32 %v849_v4, %v817_v45  ;;  %v1432_v28 = vpop.permute.xlu0 %1431  ;;  %v1355_v61 = vmul.f32 %v3068_v44, %v3581_v36  ;;  %v1138_v45 = vmul.f32 %v3016_v15, %v3583_v11 }
 0x19d   :  { %v3164_v23 = vadd.f32 %v848_v33, %v816_v5  ;;  %v1477_v54 = vmul.f32 %v3160_v62, %v1432_v28  ;;  %v1467_v31 = vmul.f32 %v3172_v60, %v1392_v49  ;;  %v3586_v33 = vld [vmem:[#allocation80_spill] sm:$0xff] }
 0x19e   :  { %v1168_v53 = vpop.permute.xlu1 %1167 }
 0x19f   :  { %v1493_v3 = vadd.f32 %v1477_v54, %v1381_v16  ;;  %v1243_v29 = vmul.f32 %v3059_v18, %v1168_v53  ;;  %v1476_v54 = vmul.f32 %v3160_v62, %v1428_v6  ;;  %v3587_v53 = vld [vmem:[#allocation79_spill] sm:$0xff]  ;;  %v3590_v6 = vld [vmem:[#allocation20_spill] sm:$0xff] }
 0x1a1   :  { %v1259_v10 = vadd.f32 %v1243_v29, %v1131_v63  ;;  %v3177_v58 = vmul.f32 %v1493_v3, %v3582_v40  ;;  %v1142_v63 = vmul.f32 %v3101_v48, %v3588_v34  ;;  %v3222_v34 = vrot.slane %v3071_v19, %v2870_v35 }
 0x1a2   :  { %v1172_v22 = vpop.permute.xlu1 %1171 }
 0x1a3   :  { %v1371_v16 = vadd.f32 %v1355_v61, %v1259_v10  ;;  %v1244_v13 = vmul.f32 %v3059_v18, %v1172_v22  ;;  %v1140_v18 = vmul.f32 %v3016_v15, %v3585_v17  ;;  %v3589_v15 = vld [vmem:[#allocation71_spill] sm:$0xff] }
 0x1a5   :  { %v1260_v47 = vadd.f32 %v1244_v13, %v3075_v42  ;;  %v1483_v59 = vadd.f32 %v1467_v31, %v1371_v16  ;;  %v1345_v13 = vrot.slane %v3590_v6, %v2774_v1 }
 0x1a6   :  { %v1180_v2 = vpop.permute.xlu1 %1179 }
 0x1a7   :  { %v1499_v8 = vmul.f32 %v1483_v59, %v3037_v27 }
 0x1a9   :  { %v1517_v24 = vsel %vm245_vm1, %v1499_v8, 0.0 }
 0x1aa   :  { %1518 = vadd.xlane.f32.xlu0 %v1517_v24  ;;  %v1188_v56 = vpop.permute.xlu1 %1187 }
 0x1ae   :  { %v1196_v57 = vpop.permute.xlu1 %1195 }
 0x1af   :  { %v1250_v4 = vmul.f32 %v3584_v41, %v1196_v57  ;;  %v3591_v57 = vld [vmem:[#allocation78_spill] sm:$0xff] }
 0x1b0   :  { %v1248_v11 = vmul.f32 %v3591_v57, %v1188_v56  ;;  %v3593_v56 = vld [vmem:[#allocation28_spill] sm:$0xff] }
 0x1b1   :  { %v1266_v49 = vadd.f32 %v1250_v4, %v1138_v45 }
 0x1b2   :  { %v1204_v5 = vpop.permute.xlu1 %1203 }
 0x1b3   :  { %v1252_v42 = vmul.f32 %v3584_v41, %v1204_v5  ;;  %v3191_v14 = vadd.f32 %v3586_v33, %v1266_v49  ;;  %v3592_v41 = vld [vmem:[#allocation57_spill] sm:$0xff] }
 0x1b4   :  { %v1136_v4 = vmul.f32 %v3012_v21, %v3592_v41 }
 0x1b5   :  { %v1268_v27 = vadd.f32 %v1252_v42, %v1140_v18 }
 0x1b6   :  { %v1212_v28 = vpop.permute.xlu1 %1211  ;;  %v1264_v17 = vadd.f32 %v1248_v11, %v1136_v4 }
 0x1b7   :  { %v1380_v3 = vadd.f32 %v3587_v53, %v1268_v27  ;;  %v1254_v29 = vmul.f32 %v3092_v26, %v1212_v28  ;;  %v3594_v28 = vld [vmem:[#allocation40_spill] sm:$0xff] }
 0x1b9   :  { %v1270_v36 = vadd.f32 %v1254_v29, %v1142_v63  ;;  %v1492_v61 = vadd.f32 %v1476_v54, %v1380_v3  ;;  %v1448_v3 = vpop.permute.xlu0 %1447 }
 0x1bb   :  { %v3199_v40 = vmul.f32 %v1492_v61, %v3589_v15 }
 0x1bc   :  { %v1276_v10 = vpop.permute.xlu1 %1275 }
 0x1bd   :  { %v1354_v22 = vmul.f32 %v3068_v44, %v1276_v10 }
 0x1bf   :  { %v1370_v31 = vadd.f32 %v1354_v22, %v3106_v55  ;;  %v3212_v55 = vrot.slane %v3590_v6, %v2870_v35  ;;  %v1246_v35 = vmul.f32 %v3591_v57, %v1180_v2 }
 0x1c0   :  { %v1292_v16 = vpop.permute.xlu1 %1291 }
 0x1c1   :  { %v1472_v18 = vmul.f32 %v3212_v55, %v3121_v43  ;;  %v1481_v43 = vmul.f32 %v3222_v34, %v1448_v3 }
 0x1c4   :  { %v1296_v59 = vpop.permute.xlu1 %1295 }
 0x1c5   :  { %v1359_v8 = vmul.f32 %v1345_v13, %v1296_v59 }
 0x1c7   :  { %v1375_v48 = vadd.f32 %v1359_v8, %v3028_v25 }
 0x1c8   :  { %v1284_v24 = vpop.permute.xlu1 %1283 }
 0x1c9   :  { %v1356_v45 = vmul.f32 %v3068_v44, %v1284_v24  ;;  %v1358_v24 = vmul.f32 %v1345_v13, %v1292_v16 }
 0x1cb   :  { %v1372_v49 = vadd.f32 %v1356_v45, %v1260_v47 }
 0x1cc   :  { %v1300_v5 = vpop.permute.xlu1 %1299 }
 0x1cd   :  { %v1360_v1 = vmul.f32 %v1345_v13, %v1300_v5 }
 0x1cf   :  { %v1376_v25 = vadd.f32 %v1360_v1, %v1264_v17  ;;  %v3596_v17 = vld [vmem:[#allocation38_spill] sm:$0xff]  ;;  %v3597_v1 = vld [vmem:[#allocation39_spill] sm:$0xff] }
 0x1d0   :  { %v1312_v42 = vpop.permute.xlu1 %1311 }
 0x1d1   :  { %v1488_v33 = vadd.f32 %v1472_v18, %v1376_v25  ;;  %v1363_v27 = vmul.f32 %v3593_v56, %v1312_v42 }
 0x1d3   :  { %v1379_v44 = vadd.f32 %v1363_v27, %v3080_v39  ;;  %v1504_v54 = vmul.f32 %v1488_v33, %v3594_v28 }
 0x1d5   :  { %v1224_v47 = vpop.permute.xlu1 %1223  ;;  %v1532_v27 = vsel %vm245_vm1, %v1504_v54, 0.0 }
 0x1d6   :  { %v1257_v53 = vmul.f32 %v3092_v26, %v1224_v47 }
 0x1d8   :  { %v1273_v63 = vadd.f32 %v1257_v53, %v3152_v12  ;;  %v3595_v12 = vld [vmem:[#allocation53_spill] sm:$0xff] }
 0x1d9   :  { %v1134_v8 = vmul.f32 %v3012_v21, %v3595_v12 }
 0x1da   :  { %v1385_v29 = vadd.f32 %v3116_v7, %v1273_v63  ;;  %v1304_v61 = vpop.permute.xlu1 %1303 }
 0x1db   :  { %v1361_v10 = vmul.f32 %v1345_v13, %v1304_v61  ;;  %v1262_v11 = vadd.f32 %v1246_v35, %v1134_v8 }
 0x1dc   :  { %v1497_v15 = vadd.f32 %v1481_v43, %v1385_v29  ;;  %v3598_v43 = vld [vmem:[#allocation19_spill] sm:$0xff] }
 0x1dd   :  { %v1377_v39 = vadd.f32 %v1361_v10, %v3050_v0  ;;  %v1374_v0 = vadd.f32 %v1358_v24, %v1262_v11 }
 0x1de   :  { %v1324_v22 = vpop.permute.xlu1 %1323  ;;  %v3229_v6 = vmul.f32 %v1497_v15, %v3162_v20  ;;  %v3599_v15 = vld [vmem:[#allocation18_spill] sm:$0xff] }
 0x1df   :  { %v1366_v26 = vmul.f32 %v3096_v30, %v1324_v22 }
 0x1e1   :  { %v1382_v59 = vadd.f32 %v1366_v26, %v1270_v36 }
 0x1e3   :  { %v1388_v19 = vpop.permute.xlu1 %1387 }
 0x1e4   :  { %v1466_v7 = vmul.f32 %v3172_v60, %v1388_v19 }
 0x1e6   :  { %v1482_v45 = vadd.f32 %v1466_v7, %v1370_v31 }
 0x1e7   :  { %v1404_v41 = vpop.permute.xlu1 %1403 }
 0x1e8   :  { %v1470_v4 = vmul.f32 %v3212_v55, %v1404_v41  ;;  %v1498_v20 = vmul.f32 %v1482_v45, %v3040_v51 }
 0x1ea   :  { %v1486_v5 = vadd.f32 %v1470_v4, %v1374_v0  ;;  %v1514_v36 = vsel %vm245_vm1, %v1498_v20, 0.0  ;;  %v1547_v20 = vsel %vm245_vm1, %v3177_v58, 0.0 }
 0x1eb   :  { %1515 = vadd.xlane.f32.xlu1 %v1514_v36  ;;  %v1408_v2 = vpop.permute.xlu1 %1407 }
 0x1ec   :  { %v1471_v57 = vmul.f32 %v3212_v55, %v1408_v2  ;;  %v1502_v21 = vmul.f32 %v1486_v5, %v3596_v17 }
 0x1ee   :  { %v1487_v16 = vadd.f32 %v1471_v57, %v1375_v48  ;;  %v1526_v13 = vsel %vm245_vm1, %v1502_v21, 0.0 }
 0x1ef   :  { %1527 = vadd.xlane.f32.xlu0 %v1526_v13 }
 0x1f0   :  { %v1332_v31 = vpop.permute.xlu1 %1331  ;;  %v1503_v18 = vmul.f32 %v1487_v16, %v3597_v1  ;;  %v3601_v16 = vlaneseq }
 0x1f1   :  { %v1368_v25 = vmul.f32 %v3096_v30, %v1332_v31 }
 0x1f2   :  { %v1529_v51 = vsel %vm245_vm1, %v1503_v18, 0.0  ;;  %v1579_v13 = vand.u32 127, %v3601_v16 }
 0x1f3   :  { %v1384_v42 = vadd.f32 %v1368_v25, %v3133_v9  ;;  %1530 = vadd.xlane.f32.xlu1 %v1529_v51 }
 0x1f4   :  { %v1591_v18 = vadd.s32 4294967280, %v1579_v13  ;;  %v1598_v51 = vadd.s32 4294967272, %v1579_v13 }
 0x1f5   :  { %v1396_v33 = vpop.permute.xlu1 %1395 }
 0x1f6   :  { %v1468_v56 = vmul.f32 %v3172_v60, %v1396_v33 }
 0x1f7   :  { %1533 = vadd.xlane.f32.xlu1 %v1532_v27 }
 0x1f8   :  { %v1484_v48 = vadd.f32 %v1468_v56, %v1372_v49 }
 0x1f9   :  { %v1420_v28 = vpop.permute.xlu1 %1419 }
 0x1fa   :  { %v1474_v47 = vmul.f32 %v3160_v62, %v1420_v28  ;;  %v1500_v53 = vmul.f32 %v1484_v48, %v3062_v37 }
 0x1fc   :  { %v1490_v3 = vadd.f32 %v1474_v47, %v3191_v14  ;;  %v1520_v30 = vsel %vm245_vm1, %v1500_v53, 0.0 }
 0x1fd   :  { %1521 = vadd.xlane.f32.xlu0 %v1520_v30  ;;  %v1424_v63 = vpop.permute.xlu1 %1423 }
 0x1fe   :  { %v1475_v9 = vmul.f32 %v3160_v62, %v1424_v63  ;;  %v1506_v29 = vmul.f32 %v1490_v3, %v3598_v43 }
 0x200   :  { %v1491_v61 = vadd.f32 %v1475_v9, %v1379_v44  ;;  %v1538_v54 = vsel %vm245_vm1, %v1506_v29, 0.0 }
 0x201   :  { %1539 = vadd.xlane.f32.xlu0 %v1538_v54  ;;  %v1400_v49 = vpop.permute.xlu1 %1399 }
 0x202   :  { %v1469_v10 = vmul.f32 %v3172_v60, %v1400_v49  ;;  %v1507_v22 = vmul.f32 %v1491_v61, %v3599_v15  ;;  %v3600_v60 = vld [vmem:[#allocation41_spill] sm:$0xff] }
 0x204   :  { %v1485_v37 = vadd.f32 %v1469_v10, %v3135_v32  ;;  %v1541_v14 = vsel %vm245_vm1, %v1507_v22, 0.0  ;;  %v1544_v32 = vsel %vm245_vm1, %v3199_v40, 0.0 }
 0x205   :  { %1542 = vadd.xlane.f32.xlu1 %v1541_v14  ;;  %v1416_v26 = vpop.permute.xlu1 %1415 }
 0x206   :  { %v1473_v35 = vmul.f32 %v3212_v55, %v1416_v26  ;;  %v1501_v62 = vmul.f32 %v1485_v37, %v3138_v46 }
 0x208   :  { %v1489_v19 = vadd.f32 %v1473_v35, %v1377_v39  ;;  %v1523_v44 = vsel %vm245_vm1, %v1501_v62, 0.0 }
 0x209   :  { %1524 = vadd.xlane.f32.xlu0 %v1523_v44  ;;  %v1436_v12 = vpop.permute.xlu1 %1435 }
 0x20a   :  { %v1478_v8 = vmul.f32 %v3222_v34, %v1436_v12  ;;  %v1505_v24 = vmul.f32 %v1489_v19, %v3600_v60 }
 0x20c   :  { %v1494_v7 = vadd.f32 %v1478_v8, %v1382_v59  ;;  %v1535_v11 = vsel %vm245_vm1, %v1505_v24, 0.0 }
 0x20d   :  { %1545 = vadd.xlane.f32.xlu0 %v1544_v32  ;;  %1536 = vadd.xlane.f32.xlu1 %v1535_v11  ;;  %v1440_v55 = vpop.permute.xlu1 %1439 }
 0x20e   :  { %v1479_v46 = vmul.f32 %v3222_v34, %v1440_v55  ;;  %v1510_v39 = vmul.f32 %v1494_v7, %v3140_v38 }
 0x210   :  { %v1495_v45 = vadd.f32 %v1479_v46, %v3154_v52  ;;  %v1550_v41 = vsel %vm245_vm1, %v1510_v39, 0.0  ;;  %v1559_v52 = vsel %vm245_vm1, %v3229_v6, 0.0  ;;  %v3602_v6 = vld [vmem:[#allocation76_spill] sm:$0xff] }
 0x211   :  { %1551 = vadd.xlane.f32.xlu1 %v1550_v41  ;;  %v1444_v0 = vpop.permute.xlu1 %1443  ;;  %v1582_v56 = vsub.s32 %v1579_v13, %v3602_v6  ;;  %v1601_v47 = vsub.s32 %v1598_v51, %v3602_v6 }
 0x212   :  { %v1480_v59 = vmul.f32 %v3222_v34, %v1444_v0  ;;  %v1511_v4 = vmul.f32 %v1495_v45, %v3147_v50 }
 0x214   :  { %v1496_v40 = vadd.f32 %v1480_v59, %v1384_v42  ;;  %v1553_v5 = vsel %vm245_vm1, %v1511_v4, 0.0  ;;  %v1594_v42 = vsub.s32 %v1591_v18, %v3602_v6 }
 0x215   :  { %1548 = vadd.xlane.f32.xlu1 %v1547_v20  ;;  %1554 = vadd.xlane.f32.xlu0 %v1553_v5 }
 0x216   :  { %v1512_v38 = vmul.f32 %v1496_v40, %v3164_v23  ;;  %v1584_v23 = vadd.s32 4294967288, %v1579_v13 }
 0x218   :  { %v1556_v36 = vsel %vm245_vm1, %v1512_v38, 0.0  ;;  %v1587_v33 = vsub.s32 %v1584_v23, %v3602_v6 }
 0x219   :  { %1560 = vadd.xlane.f32.xlu1 %v1559_v52  ;;  %1557 = vadd.xlane.f32.xlu0 %v1556_v36 }
 0x237   :  { %v1519_v34 = vpop.xlane.xlu0 %1518 }
 0x238   :  { %v1588_v15 = vrot.slane %v1519_v34, %v1587_v33 }
 0x278   :  { %v1516_v2 = vpop.xlane.xlu1 %1515 }
 0x279   :  { %v1583_v30 = vrot.slane %v1516_v2, %v1582_v56 }
 0x27b   :  { %v1590_v62 = vsel %vm1589_vm3, %v1588_v15, %v1583_v30 }
 0x27c   :  { %v1528_v50 = vpop.xlane.xlu0 %1527 }
 0x27d   :  { %v1608_v63 = vrot.slane %v1528_v50, %v1582_v56 }
 0x280   :  { %v1531_v57 = vpop.xlane.xlu1 %1530 }
 0x281   :  { %v1612_v28 = vrot.slane %v1531_v57, %v1587_v33 }
 0x283   :  { %v1613_v22 = vsel %vm1589_vm3, %v1612_v28, %v1608_v63 }
 0x284   :  { %v1534_v21 = vpop.xlane.xlu1 %1533 }
 0x285   :  { %v1617_v53 = vrot.slane %v1534_v21, %v1594_v42 }
 0x287   :  { %v1618_v26 = vsel %vm1596_vm4, %v1617_v53, %v1613_v22 }
 0x28a   :  { %v1522_v17 = vpop.xlane.xlu0 %1521 }
 0x28b   :  { %v1595_v54 = vrot.slane %v1522_v17, %v1594_v42 }
 0x28d   :  { %v1597_v24 = vsel %vm1596_vm4, %v1595_v54, %v1590_v62 }
 0x28e   :  { %v1540_v58 = vpop.xlane.xlu0 %1539 }
 0x28f   :  { %v1627_v49 = vrot.slane %v1540_v58, %v1582_v56 }
 0x292   :  { %v1543_v31 = vpop.xlane.xlu1 %1542 }
 0x293   :  { %v1631_v3 = vrot.slane %v1543_v31, %v1587_v33 }
 0x295   :  { %v1632_v35 = vsel %vm1589_vm3, %v1631_v3, %v1627_v49 }
 0x296   :  { %v1525_v1 = vpop.xlane.xlu0 %1524 }
 0x297   :  { %v1602_v37 = vrot.slane %v1525_v1, %v1601_v47 }
 0x299   :  { %v1604_v55 = vsel %vm1603_vm5, %v1602_v37, %v1597_v24 }
 0x29a   :  { %v1537_v25 = vpop.xlane.xlu1 %1536  ;;  %v1546_v27 = vpop.xlane.xlu0 %1545 }
 0x29b   :  { %v1636_v9 = vrot.slane %v1546_v27, %v1594_v42  ;;  %v1622_v43 = vrot.slane %v1537_v25, %v1601_v47 }
 0x29d   :  { %v1637_v19 = vsel %vm1596_vm4, %v1636_v9, %v1632_v35  ;;  %v1623_v44 = vsel %vm1603_vm5, %v1622_v43, %v1618_v26 }
 0x29e   :  { %v1552_v48 = vpop.xlane.xlu1 %1551  ;;  %v1663_v39 = vsel %vm1662_vm6, %v1623_v44, %v1604_v55 }
 0x29f   :  { %v1646_v12 = vrot.slane %v1552_v48, %v1582_v56 }
 0x2a2   :  { %v1555_v29 = vpop.xlane.xlu0 %1554  ;;  %v1549_v61 = vpop.xlane.xlu1 %1548 }
 0x2a3   :  { %v1641_v10 = vrot.slane %v1549_v61, %v1601_v47  ;;  %v1650_v14 = vrot.slane %v1555_v29, %v1587_v33 }
 0x2a5   :  { %v1642_v7 = vsel %vm1603_vm5, %v1641_v10, %v1637_v19  ;;  %v1651_v46 = vsel %vm1589_vm3, %v1650_v14, %v1646_v12 }
 0x2a6   :  { %v1558_v8 = vpop.xlane.xlu0 %1557  ;;  %v1561_v60 = vpop.xlane.xlu1 %1560  ;;  %v1665_v0 = vsel %vm1664_vm7, %v1642_v7, %v1663_v39 }
 0x2a7   :  { %v1655_v32 = vrot.slane %v1558_v8, %v1594_v42  ;;  %v1660_v11 = vrot.slane %v1561_v60, %v1601_v47 }
 0x2a9   :  { %v1656_v45 = vsel %vm1596_vm4, %v1655_v32, %v1651_v46 }
 0x2aa   :  { %v1661_v41 = vsel %vm1603_vm5, %v1660_v11, %v1656_v45 }
 0x2ab   :  { %v1667_v59 = vsel %vm1666_vm8, %v1661_v41, %v1665_v0 }
 0x2ac   :  { %1669 = vxpose.xlu0.b32.start.end [1/1] (short) (narrow) %v1667_v59, 32 }
 0x32c   :  { %v1685_v4 = vpop.trf.xlu0 }
 0x32d   :  { %v1701_v38 = vsel %vm107_vm2, %v1685_v4, 0.0 }
 0x330   :  { %v1686_v40 = vpop.trf.xlu0 }
 0x331   :  { %v1702_v20 = vsel %vm107_vm2, %v1686_v40, 0.0 }
 0x332   :  { %v1703_v36 = vadd.f32 %v1702_v20, %v1701_v38 }
 0x334   :  { %v1687_v5 = vpop.trf.xlu0 }
 0x335   :  { %v1704_v52 = vsel %vm107_vm2, %v1687_v5, 0.0 }
 0x336   :  { %v1705_v34 = vadd.f32 %v1704_v52, %v1703_v36 }
 0x338   :  { %v1688_v2 = vpop.trf.xlu0 }
 0x339   :  { %v1706_v50 = vsel %vm107_vm2, %v1688_v2, 0.0 }
 0x33a   :  { %v1707_v57 = vadd.f32 %v1706_v50, %v1705_v34 }
 0x33c   :  { %v1708_v17 = vrot.slane %v1707_v57, 4 }
 0x33e   :  { %v1709_v21 = vadd.f32 %v1708_v17, %v1707_v57 }
 0x340   :  { %v1710_v58 = vrot.slane %v1709_v21, 2 }
 0x342   :  { %v1711_v16 = vadd.f32 %v1710_v58, %v1709_v21 }
 0x344   :  { %v1712_v13 = vrot.slane %v1711_v16, 1 }
 0x346   :  { %v1713_v31 = vadd.f32 %v1712_v13, %v1711_v16 }
 0x348   :  { %1715 = vst.msk [vmem:[#allocation5] sm:$0x1] %vm1714_vm9, %v1713_v31 }
 0x349   :  { %1858 = shalt.err (!%p1855_p12)
}
 0x34a   :  { %s1859_s20 = scalar_lea.hbm %s3319_s5, 16 }
 0x34b   :  { %p1860_p13 = scmp.ne.s32.totalorder %s3319_s5, %s1859_s20  ;;  %p1863_p0 = scmp.lt.u32.totalorder %s1859_s20, %s3319_s5 }
 0x34d   :  { %p1865_p1 = pnand %p1863_p0, %p1860_p13 }
 0x34f   :  { %1868 = shalt.err (!%p1865_p1)
}
 0x350   :  { %1725 = dma.vmem_to_hbm [thread:$0]  %s1723_s15, 16, %s3319_s5, [#allocation4]  }
 0x351   :  { %1871 = dma.done.wait [#allocation4], 16  }
 0x352   :  { %1872 = vsyncadd [#allocation4], 4294967280 }
 0x353   :  { %1729 = vsyncpa [#allocation3], 1 }
 0x354   :  { %1730 = vsyncpa [#allocation4], 1 }

</bundles_post_ra>
